<compile_context>
chip_gen: v5e
topology: v5e:2x2
jax: 0.10.0
libtpu: 0.0.40
codegen_flags: <defaults>
</compile_context>

<pallas_src>
import functools
import numpy as np
import jax
import jax.numpy as jnp
from jax.experimental import pallas as pl
from jax.experimental.pallas import tpu as pltpu

# ---- MANO model dimensions (778 verts, 16 kinematic joints) ----
NUM_VERTS = 778
NUM_BETAS = 10
NUM_POSE_BASIS = 135            # 15 joints * 9
NUM_BLEND = NUM_BETAS + NUM_POSE_BASIS   # 145 fused blend basis rows
NUM_JOINTS = 16                 # kinematic joints (wrist + 15)
NUM_REG_JOINTS = 21             # 16 regressed joints + 5 fingertip vertices
NUM_PCA = 45                    # hands_components is (45, 45)

VPAD = 896                      # 7 * 128 : lane-aligned padded vertex count
FLAT_PAD = 3 * VPAD             # 2688    : coord-major flat length (x|y|z)
JPAD = 128                      # lane-padded joint-regressor output width

# parents[i]: 0=root; fingers are joints 1..15 = 5 fingers x 3 levels (1::3,
# 2::3, 3::3), each level's parent one level up.  Kept for documentation.
MANO_PARENTS = np.array([0, 0, 1, 2, 0, 4, 5, 0, 7, 8, 0, 10, 11, 0, 13, 14],
                        dtype=np.int32)


# =============================================================================
# Fused Pallas kernel: pose/shape blendshapes + LBS skinning + joint regression
# =============================================================================
def _mano_kernel(bp_ref, bdirs_ref, vt_ref, a_ref, wT_ref, jreg_ref,
                 verts_ref, joints_ref):
    # bp_ref   : (4B, 145) f32   [beta | pose_feature], tiled 4x over r-rows
    # bdirs_ref: (145, 2688) bf16 concatenated [shapedirs ; posedirs], coord-major
    # vt_ref   : (1, 2688) f32   v_template, coord-major, zero-padded lanes
    # a_ref    : (16B, 16) f32   a[c*4B + r*B + b, j] = A[b, j, r, c]
    # wT_ref   : (16, 896) f32   skinning weights (vertex on lane, zero-padded)
    # jreg_ref : (896, 128) bf16 padded joint regressor
    nB4 = bp_ref.shape[0]                       # 4 * B

    # v_posed (coord-major padded planes), one bf16 MXU matmul, f32 accumulate.
    vp = jnp.dot(bp_ref[...].astype(jnp.bfloat16), bdirs_ref[...],
                 preferred_element_type=jnp.float32) + vt_ref[...]   # (4B, 2688)

    # Per-vertex skinning transforms for ALL (c, r, b) rows in one matmul:
    #   T_all[c*4B + r*B + b, v] = sum_j A[b, j, r, c] * W[v, j]
    T_all = jnp.dot(a_ref[...], wT_ref[...],
                    preferred_element_type=jnp.float32)              # (16B, 896)

    # Homogeneous coordinate == 1 -> translation slab (c == 3) seeds the sum.
    # All slices are 8-sublane / 128-lane aligned (4B = 8 for B = 2).
    acc = T_all[3 * nB4:4 * nB4, :]
    for c in range(3):
        acc = acc + (T_all[c * nB4:(c + 1) * nB4, :]
                     * vp[:, c * VPAD:(c + 1) * VPAD])
    verts_ref[...] = acc                                             # (4B, 896)

    # joints[r*B + b, j] = sum_v verts[b, v, r] * Jreg[v, j]
    joints_ref[...] = jnp.dot(acc.astype(jnp.bfloat16), jreg_ref[...],
                              preferred_element_type=jnp.float32)    # (4B, 128)


def mano_lbs(bp4, blenddirs, v_template_cm, a_stack, weights_T, jreg_pad):
    B4 = bp4.shape[0]
    B16 = a_stack.shape[0]
    return pl.pallas_call(
        _mano_kernel,
        out_shape=(
            jax.ShapeDtypeStruct((B4, VPAD), jnp.float32),
            jax.ShapeDtypeStruct((B4, JPAD), jnp.float32),
        ),
        grid=(1,),
        in_specs=[
            pl.BlockSpec((B4, NUM_BLEND), lambda i: (0, 0)),
            pl.BlockSpec((NUM_BLEND, FLAT_PAD), lambda i: (0, 0)),
            pl.BlockSpec((1, FLAT_PAD), lambda i: (0, 0)),
            pl.BlockSpec((B16, NUM_JOINTS), lambda i: (0, 0)),
            pl.BlockSpec((NUM_JOINTS, VPAD), lambda i: (0, 0)),
            pl.BlockSpec((VPAD, JPAD), lambda i: (0, 0)),
        ],
        out_specs=(
            pl.BlockSpec((B4, VPAD), lambda i: (0, 0)),
            pl.BlockSpec((B4, JPAD), lambda i: (0, 0)),
        ),
        compiler_params=pltpu.CompilerParams(
            dimension_semantics=("arbitrary",)),
    )(bp4, blenddirs, v_template_cm, a_stack, weights_T, jreg_pad)


# =============================================================================
# Small rotation / kinematics helpers (plain JAX glue; tiny 3x3 / 4x4 math)
# =============================================================================
def quat2mat(quat):
    nq = quat / (jnp.linalg.norm(quat, axis=1, keepdims=True) + 1e-8)
    w, x, y, z = nq[:, 0], nq[:, 1], nq[:, 2], nq[:, 3]
    w2, x2, y2, z2 = w * w, x * x, y * y, z * z
    wx, wy, wz = w * x, w * y, w * z
    xy, xz, yz = x * y, x * z, y * z
    rot = jnp.stack([
        w2 + x2 - y2 - z2, 2 * xy - 2 * wz, 2 * wy + 2 * xz,
        2 * wz + 2 * xy, w2 - x2 + y2 - z2, 2 * yz - 2 * wx,
        2 * xz - 2 * wy, 2 * wx + 2 * yz, w2 - x2 - y2 + z2], axis=1)
    return rot.reshape(-1, 3, 3)


def batch_rodrigues(theta):
    angle = jnp.linalg.norm(theta + 1e-8, axis=1, keepdims=True)
    normalized = theta / angle
    half = angle * 0.5
    quat = jnp.concatenate([jnp.cos(half), jnp.sin(half) * normalized], axis=1)
    return quat2mat(quat)


def batch_global_rigid_transformation(Rs, Js, rotate_base=False):
    """MANO kinematic chain, level-batched (tree depth 3): 3 batched 4x4
    matmuls instead of 15 sequential dispatches."""
    B = Rs.shape[0]
    if rotate_base:
        rot_x = jnp.array([[1., 0., 0.], [0., -1., 0.], [0., 0., -1.]],
                          jnp.float32)
        root_rotation = jnp.matmul(Rs[:, 0], rot_x)
    else:
        root_rotation = Rs[:, 0]

    def make_A(R, t):
        Rt = jnp.concatenate([R, t[..., None]], axis=-1)           # (...,3,4)
        bottom = jnp.broadcast_to(
            jnp.array([0., 0., 0., 1.], jnp.float32), Rt.shape[:-2] + (1, 4))
        return jnp.concatenate([Rt, bottom], axis=-2)               # (...,4,4)

    # Level slices: joints 1::3 / 2::3 / 3::3; parents are one level up.
    A0 = make_A(root_rotation, Js[:, 0])                            # (B,4,4)
    A1 = make_A(Rs[:, 1::3], Js[:, 1::3] - Js[:, 0:1])              # (B,5,4,4)
    A2 = make_A(Rs[:, 2::3], Js[:, 2::3] - Js[:, 1::3])
    A3 = make_A(Rs[:, 3::3], Js[:, 3::3] - Js[:, 2::3])
    res1 = jnp.einsum("bik,bnkj->bnij", A0, A1)
    res2 = jnp.matmul(res1, A2)
    res3 = jnp.matmul(res2, A3)
    chain = jnp.stack([res1, res2, res3], axis=2).reshape(B, 15, 4, 4)
    results = jnp.concatenate([A0[:, None], chain], axis=1)         # (B,16,4,4)

    new_J = results[:, :, :3, 3]
    Js_w0 = jnp.concatenate(
        [Js[..., None], jnp.zeros((B, NUM_JOINTS, 1, 1), jnp.float32)], axis=2)
    init_bone = jnp.matmul(results, Js_w0)                          # (B,16,4,1)
    init_bone = jnp.pad(init_bone, ((0, 0), (0, 0), (0, 0), (3, 0)))
    return new_J, results - init_bone


# =============================================================================
# SMPL forward
# =============================================================================
@functools.partial(jax.jit, static_argnames=("get_skin",))
def smpl_forward(params, beta, theta, quat, get_skin=False):
    B = beta.shape[0]
    # pose PCA -> full axis-angle pose (B, 45)          [plain JAX, tiny]
    full_pose = theta @ params["hands_comp"] + params["hands_mean"]
    Rs = batch_rodrigues(full_pose.reshape(-1, 3)).reshape(B, 15, 3, 3)
    pose_feature = (Rs - jnp.eye(3, dtype=jnp.float32)).reshape(B, NUM_POSE_BASIS)

    # Joints of the shaped mesh via the offline-folded regressor (exact).
    J = jnp.einsum("bk,kjc->bjc", beta, params["J_shapedirs"]) + params["J_template"]

    # global rotation + level-batched kinematic chain    [plain JAX, tiny]
    R_root = quat2mat(quat).reshape(B, 1, 3, 3)
    Rs_all = jnp.concatenate([R_root, Rs], axis=1)                  # (B,16,3,3)
    _J_transformed, A = batch_global_rigid_transformation(
        Rs_all, J[:, :NUM_JOINTS, :], rotate_base=True)

    # a_stack rows ordered (c, r, b): a_stack[c*4B + r*B + b, j] = A[b, j, r, c]
    a_stack = jnp.transpose(A, (3, 2, 0, 1)).reshape(4 * 4 * B, NUM_JOINTS)
    # Blend input tiled 4x over r so the kernel's v_posed rows line up with the
    # (r, b)-ordered skinning rows (MXU M=8 costs the same as M=2).
    bp = jnp.concatenate([beta, pose_feature], axis=1)              # (B, 145)
    bp4 = jnp.tile(bp, (4, 1))                                      # (4B, 145)

    # One fused Pallas launch: blendshapes + LBS + final joint regression.
    verts_slab, joints_slab = mano_lbs(
        bp4, params["blenddirs_cm"], params["v_template_cm"], a_stack,
        params["weights_T"], params["J_regressor_pad"])

    verts = jnp.transpose(
        verts_slab.reshape(4, B, VPAD)[:3, :, :NUM_VERTS], (1, 2, 0))        # (B,778,3)
    joints = jnp.transpose(
        joints_slab.reshape(4, B, JPAD)[:3, :, :NUM_REG_JOINTS], (1, 2, 0))  # (B,21,3)
    if get_skin:
        return verts, joints, Rs
    return joints


# =============================================================================
# Pure-JAX f32 dense reference (mirrors the PyTorch module) — for validation
# =============================================================================
def smpl_reference(raw, beta, theta, quat):
    B = beta.shape[0]
    full_pose = theta @ raw["hands_comp"] + raw["hands_mean"]
    Rs = batch_rodrigues(full_pose.reshape(-1, 3)).reshape(B, 15, 3, 3)
    pose_feature = (Rs - jnp.eye(3, dtype=jnp.float32)).reshape(B, NUM_POSE_BASIS)
    v_shaped = jnp.einsum("bk,vck->bvc", beta, raw["shapedirs"]) + raw["v_template"]
    J = jnp.einsum("bvc,vj->bjc", v_shaped, raw["J_regressor"])
    v_posed = jnp.einsum("bp,vcp->bvc", pose_feature, raw["posedirs"]) + v_shaped
    R_root = quat2mat(quat).reshape(B, 1, 3, 3)
    _, A = batch_global_rigid_transformation(
        jnp.concatenate([R_root, Rs], axis=1), J[:, :NUM_JOINTS, :],
        rotate_base=True)
    T = jnp.einsum("vj,bjrc->bvrc", raw["weights"], A)
    v_homo = jnp.concatenate(
        [v_posed, jnp.ones((B, NUM_VERTS, 1), jnp.float32)], axis=2)
    verts = jnp.einsum("bvrc,bvc->bvr", T, v_homo)[:, :, :3]
    joints = jnp.einsum("bvc,vj->bjc", verts, raw["J_regressor"])
    return verts, joints, Rs


# =============================================================================
# Deterministic synthetic parameters (no pickle / file load)
# =============================================================================
def init_params(key):
    ks = jax.random.split(key, 7)
    v_template = jax.random.normal(ks[0], (NUM_VERTS, 3), jnp.float32) * 0.05
    shapedirs = jax.random.normal(ks[1], (NUM_VERTS, 3, NUM_BETAS),
                                  jnp.float32) * 0.01
    posedirs = jax.random.normal(ks[2], (NUM_VERTS, 3, NUM_POSE_BASIS),
                                 jnp.float32) * 0.01
    # J_regressor (778,16) + 5 fingertip-selector columns -> (778, 21)
    j_reg = jax.random.uniform(ks[3], (NUM_VERTS, NUM_JOINTS), jnp.float32)
    j_reg = j_reg / jnp.sum(j_reg, axis=0, keepdims=True)
    j_add = np.zeros((NUM_VERTS, 5), dtype=np.float32)
    for col, vid in enumerate([745, 333, 444, 555, 672]):
        j_add[vid, col] = 1.0
    j_reg = jnp.concatenate([j_reg, jnp.asarray(j_add)], axis=1)    # (778, 21)
    hands_comp = jax.random.normal(ks[4], (NUM_PCA, NUM_PCA), jnp.float32) * 0.1
    hands_mean = jax.random.normal(ks[5], (1, NUM_PCA), jnp.float32) * 0.1
    weights = jax.random.uniform(ks[6], (NUM_VERTS, NUM_JOINTS), jnp.float32)
    weights = weights / jnp.sum(weights, axis=1, keepdims=True)

    pad_v = VPAD - NUM_VERTS
    # coord-major, lane-padded blend basis: rows [betas ; pose basis], bf16
    shd = jnp.pad(jnp.transpose(shapedirs, (2, 1, 0)), ((0, 0), (0, 0), (0, pad_v)))
    psd = jnp.pad(jnp.transpose(posedirs, (2, 1, 0)), ((0, 0), (0, 0), (0, pad_v)))
    blenddirs_cm = jnp.concatenate(
        [shd.reshape(NUM_BETAS, FLAT_PAD), psd.reshape(NUM_POSE_BASIS, FLAT_PAD)],
        axis=0).astype(jnp.bfloat16)                                # (145, 2688)
    v_template_cm = jnp.pad(v_template.T, ((0, 0), (0, pad_v))).reshape(1, FLAT_PAD)
    # padded joint regressor (zero rows beyond 778, zero cols beyond 21), bf16
    jreg_pad = jnp.pad(j_reg, ((0, pad_v), (0, JPAD - NUM_REG_JOINTS))
                       ).astype(jnp.bfloat16)                       # (896, 128)
    # skinning weights transposed, vertex on lane, zero-padded (f32: small &
    # precision-sensitive — transforms, not blend deltas)
    weights_T = jnp.pad(jnp.transpose(weights), ((0, 0), (0, pad_v)))
    # Exact offline fold of the joint regressor through the shape basis:
    #   J(beta) = beta @ J_shapedirs + J_template
    J_shapedirs = jnp.einsum("vck,vj->kjc", shapedirs, j_reg)       # (10, 21, 3)
    J_template = jnp.einsum("vc,vj->jc", v_template, j_reg)         # (21, 3)

    params = dict(
        blenddirs_cm=blenddirs_cm,
        v_template_cm=v_template_cm,
        J_regressor_pad=jreg_pad,
        weights_T=weights_T,
        hands_comp=hands_comp,
        hands_mean=hands_mean,
        J_shapedirs=J_shapedirs,
        J_template=J_template,
    )
    raw = dict(v_template=v_template, shapedirs=shapedirs, posedirs=posedirs,
               J_regressor=j_reg, weights=weights,
               hands_comp=hands_comp, hands_mean=hands_mean)
    return params, raw


if __name__ == "__main__":
    key = jax.random.PRNGKey(0)
    pk, bk, tk, qk = jax.random.split(key, 4)
    params, raw = init_params(pk)
    B = 2
    beta = jax.random.normal(bk, (B, NUM_BETAS), jnp.float32)
    theta = jax.random.normal(tk, (B, NUM_PCA), jnp.float32)
    quat = jax.random.normal(qk, (B, 4), jnp.float32)

    verts, joints, Rs = smpl_forward(params, beta, theta, quat, get_skin=True)
    jax.block_until_ready((verts, joints, Rs))
    assert verts.shape == (B, NUM_VERTS, 3)
    assert joints.shape == (B, NUM_REG_JOINTS, 3)
    assert Rs.shape == (B, 15, 3, 3)

    # Validate against the dense f32 reference (bf16 weights -> loose atol).
    verts_ref, joints_ref, _ = smpl_reference(raw, beta, theta, quat)
    np.testing.assert_allclose(np.asarray(verts), np.asarray(verts_ref),
                               atol=2e-2, rtol=0)
    np.testing.assert_allclose(np.asarray(joints), np.asarray(joints_ref),
                               atol=2e-2, rtol=0)
    print("KERNEL_OK")
</pallas_src>

<mosaic_0001>
module attributes {stable_mosaic.version = 11 : i64} {
  func.func @_mano_kernel(%arg0: i32, %arg1: memref<8x145xf32, #tpu.memory_space<vmem>>, %arg2: memref<145x2688xbf16, #tpu.memory_space<vmem>>, %arg3: memref<1x2688xf32, #tpu.memory_space<vmem>>, %arg4: memref<32x16xf32, #tpu.memory_space<vmem>>, %arg5: memref<16x896xf32, #tpu.memory_space<vmem>>, %arg6: memref<896x128xbf16, #tpu.memory_space<vmem>>, %arg7: memref<8x896xf32, #tpu.memory_space<vmem>>, %arg8: memref<8x128xf32, #tpu.memory_space<vmem>>) attributes {dimension_semantics = [#tpu.dimension_semantics<arbitrary>], iteration_bounds = array<i64: 1>, scalar_prefetch = 0 : i64, scratch_operands = 0 : i64, tpu.core_type = #tpu.core_type<tc>, window_params = [{pipeline_mode = #tpu.pipeline_mode<synchronous>, transform_indices = @transform_0, window_bounds = array<i64: 8, 145>}, {pipeline_mode = #tpu.pipeline_mode<synchronous>, transform_indices = @transform_1, window_bounds = array<i64: 145, 2688>}, {pipeline_mode = #tpu.pipeline_mode<synchronous>, transform_indices = @transform_2, window_bounds = array<i64: 1, 2688>}, {pipeline_mode = #tpu.pipeline_mode<synchronous>, transform_indices = @transform_3, window_bounds = array<i64: 32, 16>}, {pipeline_mode = #tpu.pipeline_mode<synchronous>, transform_indices = @transform_4, window_bounds = array<i64: 16, 896>}, {pipeline_mode = #tpu.pipeline_mode<synchronous>, transform_indices = @transform_5, window_bounds = array<i64: 896, 128>}, {pipeline_mode = #tpu.pipeline_mode<synchronous>, transform_indices = @transform_6, window_bounds = array<i64: 8, 896>}, {pipeline_mode = #tpu.pipeline_mode<synchronous>, transform_indices = @transform_7, window_bounds = array<i64: 8, 128>}]} {
    %c0 = arith.constant 0 : index
    %c0_0 = arith.constant 0 : index
    %0 = vector.load %arg1[%c0, %c0_0] : memref<8x145xf32, #tpu.memory_space<vmem>>, vector<8x145xf32>
    %1 = arith.truncf %0 : vector<8x145xf32> to vector<8x145xbf16>
    %c0_1 = arith.constant 0 : index
    %c0_2 = arith.constant 0 : index
    %2 = vector.load %arg2[%c0_1, %c0_2] : memref<145x2688xbf16, #tpu.memory_space<vmem>>, vector<145x2688xbf16>
    %cst = arith.constant dense<0.000000e+00> : vector<8x2688xf32>
    %3 = tpu.matmul %1, %2, %cst {dimension_numbers = #tpu.dot_dimension_numbers<[1], [0], [0], [1], [0, 0, 1, 1], [], []>} : vector<8x145xbf16>, vector<145x2688xbf16>, vector<8x2688xf32> -> vector<8x2688xf32>
    %c0_3 = arith.constant 0 : index
    %c0_4 = arith.constant 0 : index
    %4 = vector.load %arg3[%c0_3, %c0_4] : memref<1x2688xf32, #tpu.memory_space<vmem>>, vector<1x2688xf32>
    %5 = vector.broadcast %4 : vector<1x2688xf32> to vector<8x2688xf32>
    %6 = arith.addf %3, %5 : vector<8x2688xf32>
    %c0_5 = arith.constant 0 : index
    %c0_6 = arith.constant 0 : index
    %7 = vector.load %arg4[%c0_5, %c0_6] : memref<32x16xf32, #tpu.memory_space<vmem>>, vector<32x16xf32>
    %c0_7 = arith.constant 0 : index
    %c0_8 = arith.constant 0 : index
    %8 = vector.load %arg5[%c0_7, %c0_8] : memref<16x896xf32, #tpu.memory_space<vmem>>, vector<16x896xf32>
    %cst_9 = arith.constant dense<0.000000e+00> : vector<32x896xf32>
    %9 = tpu.matmul %7, %8, %cst_9 {dimension_numbers = #tpu.dot_dimension_numbers<[1], [0], [0], [1], [0, 0, 1, 1], [], []>} : vector<32x16xf32>, vector<16x896xf32>, vector<32x896xf32> -> vector<32x896xf32>
    %10 = vector.extract_strided_slice %9 {offsets = [24, 0], sizes = [8, 896], strides = [1, 1]} : vector<32x896xf32> to vector<8x896xf32>
    %11 = vector.extract_strided_slice %9 {offsets = [0, 0], sizes = [8, 896], strides = [1, 1]} : vector<32x896xf32> to vector<8x896xf32>
    %12 = vector.extract_strided_slice %6 {offsets = [0, 0], sizes = [8, 896], strides = [1, 1]} : vector<8x2688xf32> to vector<8x896xf32>
    %13 = arith.mulf %11, %12 : vector<8x896xf32>
    %14 = arith.addf %10, %13 : vector<8x896xf32>
    %15 = vector.extract_strided_slice %9 {offsets = [8, 0], sizes = [8, 896], strides = [1, 1]} : vector<32x896xf32> to vector<8x896xf32>
    %16 = vector.extract_strided_slice %6 {offsets = [0, 896], sizes = [8, 896], strides = [1, 1]} : vector<8x2688xf32> to vector<8x896xf32>
    %17 = arith.mulf %15, %16 : vector<8x896xf32>
    %18 = arith.addf %14, %17 : vector<8x896xf32>
    %19 = vector.extract_strided_slice %9 {offsets = [16, 0], sizes = [8, 896], strides = [1, 1]} : vector<32x896xf32> to vector<8x896xf32>
    %20 = vector.extract_strided_slice %6 {offsets = [0, 1792], sizes = [8, 896], strides = [1, 1]} : vector<8x2688xf32> to vector<8x896xf32>
    %21 = arith.mulf %19, %20 : vector<8x896xf32>
    %22 = arith.addf %18, %21 : vector<8x896xf32>
    %c0_10 = arith.constant 0 : index
    %c0_11 = arith.constant 0 : index
    %23 = vector.load %arg7[%c0_10, %c0_11] : memref<8x896xf32, #tpu.memory_space<vmem>>, vector<8x896xf32>
    tpu.vector_store %arg7[%c0_10, %c0_11], %22 {strides = array<i32>} : memref<8x896xf32, #tpu.memory_space<vmem>>, vector<8x896xf32>,
    %24 = arith.truncf %22 : vector<8x896xf32> to vector<8x896xbf16>
    %c0_12 = arith.constant 0 : index
    %c0_13 = arith.constant 0 : index
    %25 = vector.load %arg6[%c0_12, %c0_13] : memref<896x128xbf16, #tpu.memory_space<vmem>>, vector<896x128xbf16>
    %cst_14 = arith.constant dense<0.000000e+00> : vector<8x128xf32>
    %26 = tpu.matmul %24, %25, %cst_14 {dimension_numbers = #tpu.dot_dimension_numbers<[1], [0], [0], [1], [0, 0, 1, 1], [], []>} : vector<8x896xbf16>, vector<896x128xbf16>, vector<8x128xf32> -> vector<8x128xf32>
    %c0_15 = arith.constant 0 : index
    %c0_16 = arith.constant 0 : index
    %27 = vector.load %arg8[%c0_15, %c0_16] : memref<8x128xf32, #tpu.memory_space<vmem>>, vector<8x128xf32>
    tpu.vector_store %arg8[%c0_15, %c0_16], %26 {strides = array<i32>} : memref<8x128xf32, #tpu.memory_space<vmem>>, vector<8x128xf32>,
    return
  }
  func.func @transform_0(%arg0: i32) -> (i32, i32) {
    %c0_i32 = arith.constant 0 : i32
    %c0_i32_0 = arith.constant 0 : i32
    %c0_i32_1 = arith.constant 0 : i32
    return %c0_i32, %c0_i32_0 : i32, i32
  }
  func.func @transform_1(%arg0: i32) -> (i32, i32) {
    %c0_i32 = arith.constant 0 : i32
    %c0_i32_0 = arith.constant 0 : i32
    %c0_i32_1 = arith.constant 0 : i32
    return %c0_i32, %c0_i32_0 : i32, i32
  }
  func.func @transform_2(%arg0: i32) -> (i32, i32) {
    %c0_i32 = arith.constant 0 : i32
    %c0_i32_0 = arith.constant 0 : i32
    %c0_i32_1 = arith.constant 0 : i32
    return %c0_i32, %c0_i32_0 : i32, i32
  }
  func.func @transform_3(%arg0: i32) -> (i32, i32) {
    %c0_i32 = arith.constant 0 : i32
    %c0_i32_0 = arith.constant 0 : i32
    %c0_i32_1 = arith.constant 0 : i32
    return %c0_i32, %c0_i32_0 : i32, i32
  }
  func.func @transform_4(%arg0: i32) -> (i32, i32) {
    %c0_i32 = arith.constant 0 : i32
    %c0_i32_0 = arith.constant 0 : i32
    %c0_i32_1 = arith.constant 0 : i32
    return %c0_i32, %c0_i32_0 : i32, i32
  }
  func.func @transform_5(%arg0: i32) -> (i32, i32) {
    %c0_i32 = arith.constant 0 : i32
    %c0_i32_0 = arith.constant 0 : i32
    %c0_i32_1 = arith.constant 0 : i32
    return %c0_i32, %c0_i32_0 : i32, i32
  }
  func.func @transform_6(%arg0: i32) -> (i32, i32) {
    %c0_i32 = arith.constant 0 : i32
    %c0_i32_0 = arith.constant 0 : i32
    %c0_i32_1 = arith.constant 0 : i32
    return %c0_i32, %c0_i32_0 : i32, i32
  }
  func.func @transform_7(%arg0: i32) -> (i32, i32) {
    %c0_i32 = arith.constant 0 : i32
    %c0_i32_0 = arith.constant 0 : i32
    %c0_i32_1 = arith.constant 0 : i32
    return %c0_i32, %c0_i32_0 : i32, i32
  }
}

</mosaic_0001>

<bundles_post_ra>
// kernel: tile.9
= control target key start
LH: loop header
LB: loop body
LE: loop exit
PB: predicated region body
PF: predicated region fallthrough
CT: control target
= control target key end

     0   :  { %vm36_vm0 = vcmask 138240   ;;  %s144_s0 = inlined_call_operand.vmem [shape: f32[4,2,145], index: 0, kind: input, shape index: {}]   ;;  %s145_s1 = inlined_call_operand.vmem [shape: f32[8,145], index: 1, kind: output, shape index: {}]  }
   0x1   :  { %v68_v0 = vld [vmem:[%s144_s0 + $0xe] sm:$0x3]  ;;  %v69_v1 = vld [vmem:[%s144_s0 + $0xc] sm:$0x3]  ;;  %v70_v2 = vld [vmem:[%s144_s0 + $0xa] sm:$0x3] }
   0x2   :  { %7 = vst [vmem:[#allocation0 + $0x8] sm:$0x3] %v68_v0  ;;  %v71_v3 = vld [vmem:[%s144_s0 + $0x8] sm:$0x3]  ;;  %v72_v4 = vld [vmem:[%s144_s0 + $0x6] sm:$0x3] }
   0x3   :  { %11 = vst [vmem:[#allocation0 + $0x38] sm:$0x3] %v69_v1  ;;  %v73_v5 = vld [vmem:[%s144_s0 + $0x4] sm:$0x3]  ;;  %v74_v6 = vld [vmem:[%s144_s0 + $0x2] sm:$0x3] }
   0x4   :  { %15 = vst [vmem:[#allocation0 + $0x20] sm:$0x3] %v70_v2  ;;  %v32_v7 = vld [vmem:[%s144_s0] sm:$0x3] }
   0x5   :  { %19 = vst [vmem:[#allocation0 + $0x28] sm:$0x3] %v71_v3 }
   0x6   :  { %23 = vst [vmem:[#allocation0 + $0x30] sm:$0x3] %v72_v4 }
   0x7   :  { %27 = vst [vmem:[#allocation0 + $0x18] sm:$0x3] %v73_v5 }
   0x8   :  { %31 = vst [vmem:[#allocation0 + $0x10] sm:$0x3] %v74_v6 }
   0x9   :  { %33 = vst [vmem:[#allocation0] sm:$0x3] %v32_v7  ;;  %v50_v8 = vld [vmem:[#allocation0 + $0x8] sm:$0x3]  }
   0xa   :  { %78 = vst.msk [vmem:[%s145_s1 + $0xe] sm:$0x3] %vm36_vm0, %v50_v8   ;;  %v65_v9 = vld [vmem:[#allocation0 + $0x38] sm:$0x3]  }
   0xb   :  { %v45_v10 = vld [vmem:[#allocation0 + $0x20] sm:$0x3]   ;;  %81 = vst [vmem:[%s145_s1 + $0x6] sm:$0x3] %v65_v9  }
   0xc   :  { %77 = vst.msk [vmem:[%s145_s1 + $0xc] sm:$0x3] %vm36_vm0, %v45_v10   ;;  %v61_v11 = vld [vmem:[#allocation0 + $0x28] sm:$0x3]  }
   0xd   :  { %v40_v12 = vld [vmem:[#allocation0 + $0x30] sm:$0x3]   ;;  %80 = vst [vmem:[%s145_s1 + $0x4] sm:$0x3] %v61_v11  }
   0xe   :  { %76 = vst.msk [vmem:[%s145_s1 + $0xa] sm:$0x3] %vm36_vm0, %v40_v12   ;;  %v57_v13 = vld [vmem:[#allocation0 + $0x18] sm:$0x3]  }
   0xf   :  { %v35_v14 = vld [vmem:[#allocation0 + $0x10] sm:$0x3]   ;;  %79 = vst [vmem:[%s145_s1 + $0x2] sm:$0x3] %v57_v13  }
  0x10   :  { %75 = vst.msk [vmem:[%s145_s1 + $0x8] sm:$0x3] %vm36_vm0, %v35_v14   ;;  %v54_v15 = vld [vmem:[#allocation0] sm:$0x3]  }
  0x11   :  { %55 = vst [vmem:[%s145_s1] sm:$0x3] %v54_v15  }

// kernel: smpl_forward.1
= control target key start
LH: loop header
LB: loop body
LE: loop exit
PB: predicated region body
PF: predicated region fallthrough
CT: control target
= control target key end

     0   :  { %vm1298_vm0 = vcmask 1040384   ;;  %v4025_v12 = vmov 0   ;;  %vm1294_vm1 = vcmask 138240   ;;  %vm1928_vm2 = vcmask 130048   ;;  %s5788_s1 = inlined_call_operand.vmem [shape: bf16[145,2688], index: 1, kind: input, shape index: {}]   ;;  %s5789_s0 = inlined_call_operand.vmem [shape: f32[8,145], index: 0, kind: input, shape index: {}]   ;;  %s5790_s4 = inlined_call_operand.vmem [shape: f32[16,896], index: 4, kind: input, shape index: {}]   ;;  %s5791_s3 = inlined_call_operand.vmem [shape: f32[32,16], index: 3, kind: input, shape index: {}]   ;;  %s5792_s2 = inlined_call_operand.vmem [shape: f32[1,2688], index: 2, kind: input, shape index: {}]   ;;  %s5793_s5 = inlined_call_operand.vmem [shape: bf16[896,128], index: 5, kind: input, shape index: {}]   ;;  %s5794_s6 = inlined_call_operand.vmem [shape: f32[8,896], index: 6, kind: output, shape index: {0}]   ;;  %s5795_s7 = inlined_call_operand.vmem [shape: f32[8,128], index: 7, kind: output, shape index: {1}]  }
   0x1   :  { %v3338_v0 = vld [vmem:[%s5788_s1 + $0x498] sm:$0xf]  ;;  %v3934_v1 = vld [vmem:[%s5788_s1 + $0x4e8] sm:$0xf0]  ;;  %v3924_v2 = vld [vmem:[%s5788_s1 + $0x49c] sm:$0xf] }
   0x2   :  { %v3339_v3 = vor.u32 %v3934_v1, %v3338_v0  ;;  %v3340_v4 = vld [vmem:[%s5788_s1 + $0x4ec] sm:$0xf0]  ;;  %v3913_v6 = vld [vmem:[%s5788_s1 + $0x440] sm:$0xf0]  ;;  %v228_v8 = vld [vmem:[%s5788_s1 + $0x5e8] sm:$0x11] }
   0x3   :  { %v3254_v5 = vld [vmem:[%s5788_s1 + $0x3f0] sm:$0xf]  ;;  %v3343_v7 = vor.u32 %v3924_v2, %v3340_v4  ;;  %v3903_v9 = vld [vmem:[%s5788_s1 + $0x3f4] sm:$0xf]  ;;  %v874_v11 = vunpack.c.l.b16 %v228_v8  ;;  %v4090_v13 = vsel %vm1298_vm0, 65535, %v4025_v12  ;;  %v875_v15 = vunpack.c.h.b16 %v228_v8  ;;  %v27_v40 = vld [vmem:[%s5789_s0 + $0x8] sm:$0xff] }
   0x4   :  { %1364 = vmatpush.bf16.msra.mxu0 %v3339_v3  ;;  %v3255_v10 = vor.u32 %v3913_v6, %v3254_v5  ;;  %v3256_v14 = vld [vmem:[%s5788_s1 + $0x444] sm:$0xf0]  ;;  %v3892_v18 = vld [vmem:[%s5788_s1 + $0x398] sm:$0xf0]  ;;  %v3422_v19 = vld [vmem:[%s5788_s1 + $0x540] sm:$0xf]  ;;  %v4164_v51 = vpack.c.bf16 %v27_v40, %v27_v40 }
   0x5   :  { %1390 = vmatpush.bf16.msra.mxu2 %v3343_v7  ;;  %v3259_v16 = vor.u32 %v3903_v9, %v3256_v14  ;;  %v3170_v17 = vld [vmem:[%s5788_s1 + $0x348] sm:$0xf]  ;;  %v1084_v20 = vpack.c.b16 %v874_v11, %v874_v11  ;;  %v1085_v21 = vpack.c.b16 %v875_v15, %v875_v15  ;;  %v3955_v22 = vld [vmem:[%s5788_s1 + $0x590] sm:$0xf0]  ;;  %v3882_v23 = vld [vmem:[%s5788_s1 + $0x34c] sm:$0xf] }
   0x6   :  { %v3172_v24 = vld [vmem:[%s5788_s1 + $0x39c] sm:$0xf0]  ;;  %v3945_v25 = vld [vmem:[%s5788_s1 + $0x544] sm:$0xf]  ;;  %v3424_v26 = vld [vmem:[%s5788_s1 + $0x594] sm:$0xf0]  ;;  %v3171_v30 = vor.u32 %v3892_v18, %v3170_v17  ;;  %v3423_v37 = vor.u32 %v3955_v22, %v3422_v19 }
   0x7   :  { %v4122_v27 = vld [vmem:[%s5788_s1 + $0x5f0] sm:$0x11]  ;;  %v1302_v28 = vand.u32 %v4090_v13, %v1084_v20  ;;  %v1305_v29 = vand.u32 %v4090_v13, %v1085_v21  ;;  %v3346_v31 = vld [vmem:[%s5788_s1 + $0x4a0] sm:$0xf]  ;;  %v3175_v34 = vor.u32 %v3882_v23, %v3172_v24  ;;  %v3427_v38 = vor.u32 %v3945_v25, %v3424_v26  ;;  %v3861_v41 = vld [vmem:[%s5788_s1 + $0x2a4] sm:$0xf] }
   0x8   :  { %1365 = vmatpush.bf16.msra.mxu0 %v3255_v10  ;;  %v3935_v32 = vld [vmem:[%s5788_s1 + $0x4f0] sm:$0xf0]  ;;  %v876_v33 = vunpack.c.l.b16 %v4122_v27  ;;  %v3086_v35 = vld [vmem:[%s5788_s1 + $0x2a0] sm:$0xf]  ;;  %v3088_v42 = vld [vmem:[%s5788_s1 + $0x2f4] sm:$0xf0]  ;;  %v877_v20 = vunpack.c.h.b16 %v4122_v27 }
   0x9   :  { %1391 = vmatpush.bf16.msra.mxu2 %v3259_v16  ;;  %v3871_v36 = vld [vmem:[%s5788_s1 + $0x2f0] sm:$0xf0]  ;;  %1383 = vmatpush.bf16.msra.mxu1 %v1302_v28  ;;  %v3347_v43 = vor.u32 %v3935_v32, %v3346_v31  ;;  %v3262_v44 = vld [vmem:[%s5788_s1 + $0x3f8] sm:$0xf]  ;;  %v3914_v45 = vld [vmem:[%s5788_s1 + $0x448] sm:$0xf0]  ;;  %v3091_v52 = vor.u32 %v3861_v41, %v3088_v42 }
   0xa   :  { %1409 = vmatpush.bf16.msra.mxu3 %v1305_v29  ;;  %v1086_v39 = vpack.c.b16 %v876_v33, %v876_v33  ;;  %v3087_v47 = vor.u32 %v3871_v36, %v3086_v35  ;;  %v3430_v48 = vld [vmem:[%s5788_s1 + $0x548] sm:$0xf]  ;;  %v3956_v49 = vld [vmem:[%s5788_s1 + $0x598] sm:$0xf0]  ;;  %v3925_v50 = vld [vmem:[%s5788_s1 + $0x4a4] sm:$0xf]  ;;  %v3263_v58 = vor.u32 %v3914_v45, %v3262_v44  ;;  %v1087_v33 = vpack.c.b16 %v877_v20, %v877_v20 }
   0xb   :  { %v3348_v53 = vld [vmem:[%s5788_s1 + $0x4f4] sm:$0xf0]  ;;  %v3850_v55 = vld [vmem:[%s5788_s1 + $0x248] sm:$0xf0]  ;;  %v3840_v56 = vld [vmem:[%s5788_s1 + $0x1fc] sm:$0xf]  ;;  %v3431_v59 = vor.u32 %v3956_v49, %v3430_v48 }
   0xc   :  { %1366 = vmatpush.bf16.msra.mxu0 %v3171_v30  ;;  %v1308_v46 = vand.u32 %v4090_v13, %v1086_v39  ;;  %v3002_v54 = vld [vmem:[%s5788_s1 + $0x1f8] sm:$0xf]  ;;  %v3004_v57 = vld [vmem:[%s5788_s1 + $0x24c] sm:$0xf0]  ;;  %v3351_v60 = vor.u32 %v3925_v50, %v3348_v53  ;;  %v3893_v63 = vld [vmem:[%s5788_s1 + $0x3a0] sm:$0xf0] }
   0xd   :  { %1392 = vmatpush.bf16.msra.mxu2 %v3175_v34  ;;  %1384 = vmatpush.bf16.msra.mxu1 %v3423_v37  ;;  %v3003_v61 = vor.u32 %v3850_v55, %v3002_v54  ;;  %v3178_v62 = vld [vmem:[%s5788_s1 + $0x350] sm:$0xf]  ;;  %v3904_v0 = vld [vmem:[%s5788_s1 + $0x3fc] sm:$0xf]  ;;  %v3007_v1 = vor.u32 %v3840_v56, %v3004_v57  ;;  %v3829_v4 = vld [vmem:[%s5788_s1 + $0x1a0] sm:$0xf0] }
   0xe   :  { %1410 = vmatpush.bf16.msra.mxu3 %v3427_v38  ;;  %v3264_v2 = vld [vmem:[%s5788_s1 + $0x44c] sm:$0xf0]  ;;  %v3819_v5 = vld [vmem:[%s5788_s1 + $0x154] sm:$0xf]  ;;  %v2920_v6 = vld [vmem:[%s5788_s1 + $0x1a4] sm:$0xf0]  ;;  %v3179_v7 = vor.u32 %v3893_v63, %v3178_v62 }
   0xf   :  { %v2918_v3 = vld [vmem:[%s5788_s1 + $0x150] sm:$0xf]  ;;  %v3267_v8 = vor.u32 %v3904_v0, %v3264_v2  ;;  %v3094_v10 = vld [vmem:[%s5788_s1 + $0x2a8] sm:$0xf]  ;;  %v3872_v11 = vld [vmem:[%s5788_s1 + $0x2f8] sm:$0xf0]  ;;  %v2923_v14 = vor.u32 %v3819_v5, %v2920_v6 }
  0x10   :  { %1367 = vmatpush.bf16.msra.mxu0 %v3087_v47  ;;  %3504 = vmatmul.msk.bf16.vlgmr.msra.gmra.mxu1 %vm1294_vm1, %v4164_v51  ;;  %v2919_v9 = vor.u32 %v3829_v4, %v2918_v3  ;;  %v3883_v12 = vld [vmem:[%s5788_s1 + $0x354] sm:$0xf]  ;;  %v3180_v15 = vld [vmem:[%s5788_s1 + $0x3a4] sm:$0xf0]  ;;  %v3808_v17 = vld [vmem:[%s5788_s1 + $0xf8] sm:$0xf0]  ;;  %v3095_v21 = vor.u32 %v3872_v11, %v3094_v10 }
  0x11   :  { %1416 = vmatpush.bf16.msrb.mxu1 %v3347_v43  ;;  %3505 = vmatmul.msk.bf16.vlgmr.msra.gmra.mxu3 %vm1294_vm1, %v4164_v51  ;;  %v2834_v16 = vld [vmem:[%s5788_s1 + $0xa8] sm:$0xf]  ;;  %v3798_v18 = vld [vmem:[%s5788_s1 + $0xac] sm:$0xf]  ;;  %v2836_v19 = vld [vmem:[%s5788_s1 + $0xfc] sm:$0xf0]  ;;  %v3183_v22 = vor.u32 %v3883_v12, %v3180_v15 }
  0x12   :  { %1435 = vmatpush.bf16.msrb.mxu3 %v1308_v46  ;;  %1393 = vmatpush.bf16.msra.mxu2 %v3091_v52  ;;  %v2835_v23 = vor.u32 %v3808_v17, %v2834_v16  ;;  %v3010_v24 = vld [vmem:[%s5788_s1 + $0x200] sm:$0xf]  ;;  %v3851_v25 = vld [vmem:[%s5788_s1 + $0x250] sm:$0xf0]  ;;  %v3862_v26 = vld [vmem:[%s5788_s1 + $0x2ac] sm:$0xf]  ;;  %v2839_v27 = vor.u32 %v3798_v18, %v2836_v19  ;;  %v1311_v46 = vand.u32 %v4090_v13, %v1087_v33 }
  0x13   :  { %v3096_v28 = vld [vmem:[%s5788_s1 + $0x2fc] sm:$0xf0]  ;;  %v3787_v30 = vld [vmem:[%s5788_s1 + $0x50] sm:$0xf0]  ;;  %v3777_v31 = vld [vmem:[%s5788_s1 + $0x4] sm:$0xf]  ;;  %v3011_v34 = vor.u32 %v3851_v25, %v3010_v24 }
  0x14   :  { %1368 = vmatpush.bf16.msra.mxu0 %v3003_v61  ;;  %v2750_v29 = vld [vmem:[%s5788_s1] sm:$0xf]  ;;  %v2752_v32 = vld [vmem:[%s5788_s1 + $0x54] sm:$0xf0]  ;;  %v3354_v35 = vld [vmem:[%s5788_s1 + $0x4a8] sm:$0xf]  ;;  %v3099_v37 = vor.u32 %v3862_v26, %v3096_v28 }
  0x15   :  { %1417 = vmatpush.bf16.msrb.mxu1 %v3263_v58  ;;  %v3936_v36 = vld [vmem:[%s5788_s1 + $0x4f8] sm:$0xf0]  ;;  %v2751_v38 = vor.u32 %v3787_v30, %v2750_v29  ;;  %v2926_v39 = vld [vmem:[%s5788_s1 + $0x158] sm:$0xf]  ;;  %v3830_v40 = vld [vmem:[%s5788_s1 + $0x1a8] sm:$0xf0]  ;;  %v2755_v42 = vor.u32 %v3777_v31, %v2752_v32 }
  0x16   :  { %1436 = vmatpush.bf16.msrb.mxu3 %v3431_v59  ;;  %1394 = vmatpush.bf16.msra.mxu2 %v3007_v1  ;;  %v3841_v41 = vld [vmem:[%s5788_s1 + $0x204] sm:$0xf]  ;;  %v3012_v43 = vld [vmem:[%s5788_s1 + $0x254] sm:$0xf0]  ;;  %v3355_v47 = vor.u32 %v3936_v36, %v3354_v35  ;;  %v2842_v48 = vld [vmem:[%s5788_s1 + $0xb0] sm:$0xf]  ;;  %v2927_v50 = vor.u32 %v3830_v40, %v2926_v39 }
  0x17   :  { %v26_v44 = vld [vmem:[%s5789_s0] sm:$0xff]  ;;  %v230_v45 = vld [vmem:[%s5788_s1 + $0x5f8] sm:$0x11]  ;;  %v3946_v49 = vld [vmem:[%s5788_s1 + $0x54c] sm:$0xf]  ;;  %v3015_v55 = vor.u32 %v3841_v41, %v3012_v43 }
  0x18   :  { %1369 = vmatpush.bf16.msra.mxu0 %v2919_v9  ;;  %v3432_v52 = vld [vmem:[%s5788_s1 + $0x59c] sm:$0xf0]  ;;  %v3915_v54 = vld [vmem:[%s5788_s1 + $0x450] sm:$0xf0]  ;;  %v4298_v56 = vpack.c.bf16 %v26_v44, %v26_v44  ;;  %v3809_v57 = vld [vmem:[%s5788_s1 + $0x100] sm:$0xf0] }
  0x19   :  { %1418 = vmatpush.bf16.msrb.mxu1 %v3179_v7  ;;  %v3270_v53 = vld [vmem:[%s5788_s1 + $0x400] sm:$0xf]  ;;  %v3926_v58 = vld [vmem:[%s5788_s1 + $0x4ac] sm:$0xf]  ;;  %v3820_v61 = vld [vmem:[%s5788_s1 + $0x15c] sm:$0xf]  ;;  %v3435_v63 = vor.u32 %v3946_v49, %v3432_v52  ;;  %v2843_v1 = vor.u32 %v3809_v57, %v2842_v48 }
  0x1a   :  { %1442 = vmatpush.bf16.msra.mxu3 %v3351_v60  ;;  %1395 = vmatpush.bf16.msra.mxu2 %v2923_v14  ;;  %v3356_v59 = vld [vmem:[%s5788_s1 + $0x4fc] sm:$0xf0]  ;;  %v879_v60 = vunpack.c.h.b16 %v230_v45  ;;  %v2928_v62 = vld [vmem:[%s5788_s1 + $0x1ac] sm:$0xf0]  ;;  %v3271_v0 = vor.u32 %v3915_v54, %v3270_v53  ;;  %v2758_v3 = vld [vmem:[%s5788_s1 + $0x8] sm:$0xf]  ;;  %v878_v14 = vunpack.c.l.b16 %v230_v45 }
  0x1b   :  { %v3359_v2 = vor.u32 %v3926_v58, %v3356_v59  ;;  %v3186_v4 = vld [vmem:[%s5788_s1 + $0x358] sm:$0xf]  ;;  %v3894_v5 = vld [vmem:[%s5788_s1 + $0x3a8] sm:$0xf0]  ;;  %v2931_v6 = vor.u32 %v3820_v61, %v2928_v62  ;;  %v3788_v7 = vld [vmem:[%s5788_s1 + $0x58] sm:$0xf0] }
  0x1c   :  { %1370 = vmatpush.bf16.msra.mxu0 %v2835_v23  ;;  %v3272_v9 = vld [vmem:[%s5788_s1 + $0x454] sm:$0xf0]  ;;  %v1089_v10 = vpack.c.b16 %v879_v60, %v879_v60  ;;  %v3799_v11 = vld [vmem:[%s5788_s1 + $0xb4] sm:$0xf]  ;;  %v2844_v12 = vld [vmem:[%s5788_s1 + $0x104] sm:$0xf0]  ;;  %v3187_v15 = vor.u32 %v3894_v5, %v3186_v4  ;;  %v2759_v16 = vor.u32 %v3788_v7, %v2758_v3  ;;  %v1088_v28 = vpack.c.b16 %v878_v14, %v878_v14 }
  0x1d   :  { %1419 = vmatpush.bf16.msrb.mxu1 %v3095_v21  ;;  %v3102_v18 = vld [vmem:[%s5788_s1 + $0x2b0] sm:$0xf]  ;;  %v3873_v19 = vld [vmem:[%s5788_s1 + $0x300] sm:$0xf0]  ;;  %v2847_v20 = vor.u32 %v3799_v11, %v2844_v12  ;;  %v3884_v23 = vld [vmem:[%s5788_s1 + $0x35c] sm:$0xf] }
  0x1e   :  { %1443 = vmatpush.bf16.msra.mxu3 %v3267_v8  ;;  %1396 = vmatpush.bf16.msra.mxu2 %v2839_v27  ;;  %v3905_v8 = vld [vmem:[%s5788_s1 + $0x404] sm:$0xf]  ;;  %v1317_v21 = vand.u32 %v4090_v13, %v1089_v10  ;;  %v3188_v24 = vld [vmem:[%s5788_s1 + $0x3ac] sm:$0xf0]  ;;  %v2760_v25 = vld [vmem:[%s5788_s1 + $0x5c] sm:$0xf0]  ;;  %v3103_v29 = vor.u32 %v3873_v19, %v3102_v18  ;;  %v1314_v39 = vand.u32 %v4090_v13, %v1088_v28 }
  0x1f   :  { %v3275_v17 = vor.u32 %v3905_v8, %v3272_v9  ;;  %v3947_v26 = vld [vmem:[%s5788_s1 + $0x554] sm:$0xf]  ;;  %v3440_v27 = vld [vmem:[%s5788_s1 + $0x5a4] sm:$0xf0]  ;;  %v3191_v32 = vor.u32 %v3884_v23, %v3188_v24  ;;  %v3438_v41 = vld [vmem:[%s5788_s1 + $0x550] sm:$0xf] }
  0x20   :  { %1371 = vmatpush.bf16.msra.mxu0 %v2751_v38  ;;  %v3927_v30 = vld [vmem:[%s5788_s1 + $0x4b4] sm:$0xf]  ;;  %v3364_v31 = vld [vmem:[%s5788_s1 + $0x504] sm:$0xf0]  ;;  %v3443_v36 = vor.u32 %v3947_v26, %v3440_v27  ;;  %v3906_v44 = vld [vmem:[%s5788_s1 + $0x40c] sm:$0xf] }
  0x21   :  { %1420 = vmatpush.bf16.msrb.mxu1 %v3011_v34  ;;  %3506 = vmatmul.msk.bf16.vlgmr.msrb.gmra.mxu3 %vm1294_vm1, %v4164_v51  ;;  %v3018_v33 = vld [vmem:[%s5788_s1 + $0x208] sm:$0xf]  ;;  %v3852_v34 = vld [vmem:[%s5788_s1 + $0x258] sm:$0xf0]  ;;  %v3367_v40 = vor.u32 %v3927_v30, %v3364_v31  ;;  %v3280_v45 = vld [vmem:[%s5788_s1 + $0x45c] sm:$0xf0] }
  0x22   :  { %1444 = vmatpush.bf16.msra.mxu3 %v3183_v22  ;;  %1397 = vmatpush.bf16.msra.mxu2 %v2755_v42  ;;  %v3778_v22 = vld [vmem:[%s5788_s1 + $0xc] sm:$0xf]  ;;  %v3104_v38 = vld [vmem:[%s5788_s1 + $0x304] sm:$0xf0]  ;;  %v3957_v42 = vld [vmem:[%s5788_s1 + $0x5a0] sm:$0xf0]  ;;  %v3019_v43 = vor.u32 %v3852_v34, %v3018_v33  ;;  %v3283_v57 = vor.u32 %v3906_v44, %v3280_v45 }
  0x23   :  { %1372 = vmatmul.bf16.vlgmr.msra.gmra.mxu0 %v4298_v56  ;;  %v2763_v35 = vor.u32 %v3778_v22, %v2760_v25  ;;  %v3937_v48 = vld [vmem:[%s5788_s1 + $0x500] sm:$0xf0]  ;;  %v2934_v49 = vld [vmem:[%s5788_s1 + $0x160] sm:$0xf]  ;;  %v3842_v52 = vld [vmem:[%s5788_s1 + $0x20c] sm:$0xf] }
  0x24   :  { %1461 = vmatpush.bf16.msrb.mxu0 %v1311_v46  ;;  %v3362_v46 = vld [vmem:[%s5788_s1 + $0x4b0] sm:$0xf]  ;;  %v3020_v53 = vld [vmem:[%s5788_s1 + $0x25c] sm:$0xf0]  ;;  %v3885_v60 = vld [vmem:[%s5788_s1 + $0x364] sm:$0xf] }
  0x25   :  { %1421 = vmatpush.bf16.msrb.mxu1 %v2927_v50  ;;  %1398 = vmatmul.bf16.vlgmr.msra.gmra.mxu2 %v4298_v56  ;;  %v3831_v50 = vld [vmem:[%s5788_s1 + $0x1b0] sm:$0xf0]  ;;  %v231_v54 = vld [vmem:[%s5788_s1 + $0x600] sm:$0x11]  ;;  %v3363_v58 = vor.u32 %v3937_v48, %v3362_v46  ;;  %v3196_v61 = vld [vmem:[%s5788_s1 + $0x3b4] sm:$0xf0] }
  0x26   :  { %1445 = vmatpush.bf16.msra.mxu3 %v3099_v37  ;;  %1468 = vmatpush.bf16.msrb.mxu2 %v3355_v47  ;;  %v3863_v37 = vld [vmem:[%s5788_s1 + $0x2b4] sm:$0xf]  ;;  %v2935_v59 = vor.u32 %v3831_v50, %v2934_v49  ;;  %v3278_v62 = vld [vmem:[%s5788_s1 + $0x408] sm:$0xf]  ;;  %v880_v3 = vunpack.c.l.b16 %v231_v54  ;;  %v3821_v4 = vld [vmem:[%s5788_s1 + $0x164] sm:$0xf] }
  0x27   :  { %v3107_v47 = vor.u32 %v3863_v37, %v3104_v38  ;;  %v2936_v5 = vld [vmem:[%s5788_s1 + $0x1b4] sm:$0xf0]  ;;  %v3864_v9 = vld [vmem:[%s5788_s1 + $0x2bc] sm:$0xf]  ;;  %v3112_v10 = vld [vmem:[%s5788_s1 + $0x30c] sm:$0xf0] }
  0x28   :  { %1462 = vmatpush.bf16.msrb.mxu0 %v3435_v63  ;;  %v3023_v63 = vor.u32 %v3842_v52, %v3020_v53  ;;  %v3194_v11 = vld [vmem:[%s5788_s1 + $0x360] sm:$0xf]  ;;  %v2939_v12 = vor.u32 %v3821_v4, %v2936_v5  ;;  %v3895_v14 = vld [vmem:[%s5788_s1 + $0x3b0] sm:$0xf0]  ;;  %v3800_v18 = vld [vmem:[%s5788_s1 + $0xbc] sm:$0xf] }
  0x29   :  { %1422 = vmatpush.bf16.msrb.mxu1 %v2843_v1  ;;  %v2850_v1 = vld [vmem:[%s5788_s1 + $0xb8] sm:$0xf]  ;;  %v2852_v19 = vld [vmem:[%s5788_s1 + $0x10c] sm:$0xf0]  ;;  %v3195_v22 = vor.u32 %v3895_v14, %v3194_v11  ;;  %v3843_v24 = vld [vmem:[%s5788_s1 + $0x214] sm:$0xf] }
  0x2a   :  { %1446 = vmatpush.bf16.msra.mxu3 %v3015_v55  ;;  %1469 = vmatpush.bf16.msrb.mxu2 %v3271_v0  ;;  %v3439_v55 = vor.u32 %v3957_v42, %v3438_v41  ;;  %v3916_v0 = vld [vmem:[%s5788_s1 + $0x458] sm:$0xf0]  ;;  %v3028_v25 = vld [vmem:[%s5788_s1 + $0x264] sm:$0xf0]  ;;  %v2855_v26 = vor.u32 %v3800_v18, %v2852_v19  ;;  %v3110_v28 = vld [vmem:[%s5788_s1 + $0x2b8] sm:$0xf] }
  0x2b   :  { %v3279_v7 = vor.u32 %v3916_v0, %v3278_v62  ;;  %v3779_v30 = vld [vmem:[%s5788_s1 + $0x14] sm:$0xf]  ;;  %v2768_v31 = vld [vmem:[%s5788_s1 + $0x64] sm:$0xf0]  ;;  %v3031_v33 = vor.u32 %v3843_v24, %v3028_v25  ;;  %v3446_v34 = vld [vmem:[%s5788_s1 + $0x558] sm:$0xf] }
  0x2c   :  { %1494 = vmatpush.bf16.msra.mxu0 %v3359_v2  ;;  %v3810_v2 = vld [vmem:[%s5788_s1 + $0x108] sm:$0xf0]  ;;  %v2944_v38 = vld [vmem:[%s5788_s1 + $0x1bc] sm:$0xf0]  ;;  %v2771_v41 = vor.u32 %v3779_v30, %v2768_v31  ;;  %v3026_v42 = vld [vmem:[%s5788_s1 + $0x210] sm:$0xf] }
  0x2d   :  { %1423 = vmatpush.bf16.msrb.mxu1 %v2759_v16  ;;  %v2851_v8 = vor.u32 %v3810_v2, %v2850_v1  ;;  %v3789_v16 = vld [vmem:[%s5788_s1 + $0x60] sm:$0xf0]  ;;  %v2860_v50 = vld [vmem:[%s5788_s1 + $0x114] sm:$0xf0]  ;;  %v3948_v52 = vld [vmem:[%s5788_s1 + $0x55c] sm:$0xf] }
  0x2e   :  { %1447 = vmatpush.bf16.msra.mxu3 %v2931_v6  ;;  %1470 = vmatpush.bf16.msrb.mxu2 %v3187_v15  ;;  %v3199_v6 = vor.u32 %v3885_v60, %v3196_v61  ;;  %v2766_v15 = vld [vmem:[%s5788_s1 + $0x10] sm:$0xf]  ;;  %v3801_v46 = vld [vmem:[%s5788_s1 + $0xc4] sm:$0xf]  ;;  %v3928_v60 = vld [vmem:[%s5788_s1 + $0x4bc] sm:$0xf] }
  0x2f   :  { %v2767_v23 = vor.u32 %v3789_v16, %v2766_v15  ;;  %v3448_v53 = vld [vmem:[%s5788_s1 + $0x5ac] sm:$0xf0]  ;;  %v2863_v0 = vor.u32 %v3801_v46, %v2860_v50  ;;  %v3780_v2 = vld [vmem:[%s5788_s1 + $0x1c] sm:$0xf]  ;;  %v3288_v11 = vld [vmem:[%s5788_s1 + $0x464] sm:$0xf0] }
  0x30   :  { %1495 = vmatpush.bf16.msra.mxu0 %v3275_v17  ;;  %1424 = vmatmul.bf16.vlgmr.msrb.gmra.mxu1 %v4298_v56  ;;  %v1090_v17 = vpack.c.b16 %v880_v3, %v880_v3  ;;  %v3372_v61 = vld [vmem:[%s5788_s1 + $0x50c] sm:$0xf0]  ;;  %v3118_v19 = vld [vmem:[%s5788_s1 + $0x2c0] sm:$0xf]  ;;  %v3886_v24 = vld [vmem:[%s5788_s1 + $0x36c] sm:$0xf] }
  0x31   :  { %1513 = vmatpush.bf16.msra.mxu1 %v1317_v21  ;;  %v3115_v21 = vor.u32 %v3864_v9, %v3112_v10  ;;  %v2776_v3 = vld [vmem:[%s5788_s1 + $0x6c] sm:$0xf0]  ;;  %v3375_v5 = vor.u32 %v3928_v60, %v3372_v61  ;;  %v3811_v9 = vld [vmem:[%s5788_s1 + $0x110] sm:$0xf0]  ;;  %v3204_v25 = vld [vmem:[%s5788_s1 + $0x3bc] sm:$0xf0] }
  0x32   :  { %1448 = vmatpush.bf16.msra.mxu3 %v2847_v20  ;;  %1471 = vmatpush.bf16.msrb.mxu2 %v3103_v29  ;;  %v881_v20 = vunpack.c.h.b16 %v231_v54  ;;  %v1320_v27 = vand.u32 %v4090_v13, %v1090_v17  ;;  %v3874_v29 = vld [vmem:[%s5788_s1 + $0x308] sm:$0xf0]  ;;  %v3907_v10 = vld [vmem:[%s5788_s1 + $0x414] sm:$0xf]  ;;  %v2779_v15 = vor.u32 %v3780_v2, %v2776_v3  ;;  %v3929_v30 = vld [vmem:[%s5788_s1 + $0x4c4] sm:$0xf] }
  0x33   :  { %3507 = vmatmul.msk.bf16.vlgmr.msrb.gmra.mxu0 %vm1294_vm1, %v4164_v51  ;;  %v3111_v37 = vor.u32 %v3874_v29, %v3110_v28  ;;  %v3291_v18 = vor.u32 %v3907_v10, %v3288_v11  ;;  %v3456_v28 = vld [vmem:[%s5788_s1 + $0x5b4] sm:$0xf0]  ;;  %v3378_v46 = vld [vmem:[%s5788_s1 + $0x4c0] sm:$0xf]  ;;  %v3833_v50 = vld [vmem:[%s5788_s1 + $0x1c0] sm:$0xf0] }
  0x34   :  { %1496 = vmatpush.bf16.msra.mxu0 %v3191_v32  ;;  %v1091_v32 = vpack.c.b16 %v881_v20, %v881_v20  ;;  %v3875_v20 = vld [vmem:[%s5788_s1 + $0x310] sm:$0xf0]  ;;  %v3380_v31 = vld [vmem:[%s5788_s1 + $0x514] sm:$0xf0]  ;;  %v3212_v61 = vld [vmem:[%s5788_s1 + $0x3c4] sm:$0xf0] }
  0x35   :  { %1514 = vmatpush.bf16.msra.mxu1 %v3443_v36  ;;  %v3822_v36 = vld [vmem:[%s5788_s1 + $0x16c] sm:$0xf]  ;;  %v3119_v29 = vor.u32 %v3875_v20, %v3118_v19  ;;  %v3812_v2 = vld [vmem:[%s5788_s1 + $0x118] sm:$0xf0]  ;;  %v3128_v10 = vld [vmem:[%s5788_s1 + $0x31c] sm:$0xf0] }
  0x36   :  { %1449 = vmatpush.bf16.msra.mxu3 %v2763_v35  ;;  %1472 = vmatpush.bf16.msrb.mxu2 %v3019_v43  ;;  %v3958_v35 = vld [vmem:[%s5788_s1 + $0x5a8] sm:$0xf0]  ;;  %v3853_v43 = vld [vmem:[%s5788_s1 + $0x260] sm:$0xf0]  ;;  %v1323_v45 = vand.u32 %v4090_v13, %v1091_v32  ;;  %v2947_v48 = vor.u32 %v3822_v36, %v2944_v38  ;;  %v3210_v11 = vld [vmem:[%s5788_s1 + $0x370] sm:$0xf] }
  0x37   :  { %v3447_v44 = vor.u32 %v3958_v35, %v3446_v34  ;;  %v3027_v54 = vor.u32 %v3853_v43, %v3026_v42  ;;  %v3034_v34 = vld [vmem:[%s5788_s1 + $0x218] sm:$0xf]  ;;  %v3854_v35 = vld [vmem:[%s5788_s1 + $0x268] sm:$0xf0]  ;;  %v3865_v38 = vld [vmem:[%s5788_s1 + $0x2c4] sm:$0xf] }
  0x38   :  { %1497 = vmatpush.bf16.msra.mxu0 %v3107_v47  ;;  %v232_v47 = vld [vmem:[%s5788_s1 + $0x608] sm:$0x11]  ;;  %v3959_v42 = vld [vmem:[%s5788_s1 + $0x5b0] sm:$0xf0]  ;;  %v3908_v43 = vld [vmem:[%s5788_s1 + $0x41c] sm:$0xf] }
  0x39   :  { %1546 = vmatpush.bf16.msrb.mxu1 %v3367_v40  ;;  %1450 = vmatmul.bf16.vlgmr.msra.gmra.mxu3 %v4298_v56  ;;  %v3938_v40 = vld [vmem:[%s5788_s1 + $0x508] sm:$0xf0]  ;;  %v883_v62 = vunpack.c.h.b16 %v232_v47  ;;  %v882_v14 = vunpack.c.l.b16 %v232_v47  ;;  %v3939_v47 = vld [vmem:[%s5788_s1 + $0x510] sm:$0xf0]  ;;  %v2868_v19 = vld [vmem:[%s5788_s1 + $0x11c] sm:$0xf0] }
  0x3a   :  { %1487 = vmatpush.bf16.msrb.mxu3 %v1314_v39  ;;  %1473 = vmatpush.bf16.msrb.mxu2 %v2935_v59  ;;  %v3370_v39 = vld [vmem:[%s5788_s1 + $0x4b8] sm:$0xf]  ;;  %v3832_v59 = vld [vmem:[%s5788_s1 + $0x1b8] sm:$0xf0] }
  0x3b   :  { %v3371_v49 = vor.u32 %v3938_v40, %v3370_v39  ;;  %v3120_v39 = vld [vmem:[%s5788_s1 + $0x314] sm:$0xf0]  ;;  %v3383_v40 = vor.u32 %v3929_v30, %v3380_v31  ;;  %v3781_v30 = vld [vmem:[%s5788_s1 + $0x24] sm:$0xf] }
  0x3c   :  { %1498 = vmatpush.bf16.msra.mxu0 %v3023_v63  ;;  %v3451_v63 = vor.u32 %v3948_v52, %v3448_v53  ;;  %v3844_v53 = vld [vmem:[%s5788_s1 + $0x21c] sm:$0xf]  ;;  %v2784_v31 = vld [vmem:[%s5788_s1 + $0x74] sm:$0xf0] }
  0x3d   :  { %1547 = vmatpush.bf16.msrb.mxu1 %v3283_v57  ;;  %v3917_v57 = vld [vmem:[%s5788_s1 + $0x460] sm:$0xf0] }
  0x3e   :  { %1488 = vmatpush.bf16.msrb.mxu3 %v3439_v55  ;;  %1474 = vmatpush.bf16.msrb.mxu2 %v2851_v8  ;;  %v3286_v55 = vld [vmem:[%s5788_s1 + $0x410] sm:$0xf]  ;;  %v2858_v8 = vld [vmem:[%s5788_s1 + $0xc0] sm:$0xf] }
  0x3f   :  { %v3287_v1 = vor.u32 %v3917_v57, %v3286_v55  ;;  %v2859_v17 = vor.u32 %v3811_v9, %v2858_v8  ;;  %v233_v55 = vld [vmem:[%s5788_s1 + $0x610] sm:$0x11]  ;;  %v3866_v8 = vld [vmem:[%s5788_s1 + $0x2cc] sm:$0xf] }
  0x40   :  { %1499 = vmatpush.bf16.msra.mxu0 %v2939_v12  ;;  %3509 = vmatmul.msk.bf16.vlgmr.msra.gmra.mxu1 %vm1294_vm1, %v4164_v51  ;;  %v1093_v12 = vpack.c.b16 %v883_v62, %v883_v62  ;;  %v3294_v62 = vld [vmem:[%s5788_s1 + $0x418] sm:$0xf]  ;;  %v884_v3 = vunpack.c.l.b16 %v233_v55  ;;  %v885_v20 = vunpack.c.h.b16 %v233_v55  ;;  %v3919_v55 = vld [vmem:[%s5788_s1 + $0x470] sm:$0xf0] }
  0x41   :  { %1548 = vmatpush.bf16.msrb.mxu1 %v3199_v6  ;;  %v3202_v6 = vld [vmem:[%s5788_s1 + $0x368] sm:$0xf] }
  0x42   :  { %1520 = vmatpush.bf16.msra.mxu3 %v3363_v58  ;;  %1475 = vmatpush.bf16.msrb.mxu2 %v2767_v23  ;;  %v2942_v58 = vld [vmem:[%s5788_s1 + $0x168] sm:$0xf]  ;;  %v3790_v23 = vld [vmem:[%s5788_s1 + $0x68] sm:$0xf0] }
  0x43   :  { %v2943_v4 = vor.u32 %v3832_v59, %v2942_v58  ;;  %v3379_v58 = vor.u32 %v3939_v47, %v3378_v46  ;;  %v3887_v59 = vld [vmem:[%s5788_s1 + $0x374] sm:$0xf] }
  0x44   :  { %1500 = vmatpush.bf16.msra.mxu0 %v2855_v26  ;;  %v1092_v26 = vpack.c.b16 %v882_v14, %v882_v14 }
  0x45   :  { %1549 = vmatpush.bf16.msrb.mxu1 %v3115_v21  ;;  %1476 = vmatmul.bf16.vlgmr.msrb.gmra.mxu2 %v4298_v56  ;;  %v2774_v21 = vld [vmem:[%s5788_s1 + $0x18] sm:$0xf] }
  0x46   :  { %1521 = vmatpush.bf16.msra.mxu3 %v3279_v7  ;;  %1539 = vmatpush.bf16.msra.mxu2 %v1320_v27  ;;  %v3896_v7 = vld [vmem:[%s5788_s1 + $0x3b8] sm:$0xf0]  ;;  %v3949_v27 = vld [vmem:[%s5788_s1 + $0x564] sm:$0xf]  ;;  %v2775_v32 = vor.u32 %v3790_v23, %v2774_v21  ;;  %v3131_v21 = vor.u32 %v3866_v8, %v3128_v10  ;;  %v2874_v8 = vld [vmem:[%s5788_s1 + $0xd0] sm:$0xf] }
  0x47   :  { %v3203_v16 = vor.u32 %v3896_v7, %v3202_v6  ;;  %v3459_v36 = vor.u32 %v3949_v27, %v3456_v28  ;;  %v3215_v6 = vor.u32 %v3887_v59, %v3212_v61  ;;  %v3845_v23 = vld [vmem:[%s5788_s1 + $0x224] sm:$0xf]  ;;  %v3876_v27 = vld [vmem:[%s5788_s1 + $0x318] sm:$0xf0]  ;;  %v3834_v59 = vld [vmem:[%s5788_s1 + $0x1c8] sm:$0xf0] }
  0x48   :  { %1501 = vmatpush.bf16.msra.mxu0 %v2771_v41  ;;  %v3454_v41 = vld [vmem:[%s5788_s1 + $0x560] sm:$0xf]  ;;  %v3930_v61 = vld [vmem:[%s5788_s1 + $0x4cc] sm:$0xf] }
  0x49   :  { %1550 = vmatpush.bf16.msrb.mxu1 %v3031_v33  ;;  %3508 = vmatmul.msk.bf16.vlgmr.msrb.gmra.mxu3 %vm1294_vm1, %v4164_v51  ;;  %v3207_v33 = vor.u32 %v3886_v24, %v3204_v25  ;;  %v3455_v52 = vor.u32 %v3959_v42, %v3454_v41  ;;  %v3044_v25 = vld [vmem:[%s5788_s1 + $0x274] sm:$0xf0]  ;;  %v3042_v41 = vld [vmem:[%s5788_s1 + $0x220] sm:$0xf]  ;;  %v3855_v42 = vld [vmem:[%s5788_s1 + $0x270] sm:$0xf0] }
  0x4a   :  { %1522 = vmatpush.bf16.msra.mxu3 %v3195_v22  ;;  %1540 = vmatpush.bf16.msra.mxu2 %v3447_v44  ;;  %v1329_v22 = vand.u32 %v4090_v13, %v1093_v12  ;;  %v3035_v44 = vor.u32 %v3854_v35, %v3034_v34  ;;  %v3897_v12 = vld [vmem:[%s5788_s1 + $0x3c0] sm:$0xf0]  ;;  %v1095_v34 = vpack.c.b16 %v885_v20, %v885_v20 }
  0x4b   :  { %1502 = vmatmul.bf16.vlgmr.msra.gmra.mxu0 %v4298_v56  ;;  %v3047_v35 = vor.u32 %v3845_v23, %v3044_v25  ;;  %v3792_v23 = vld [vmem:[%s5788_s1 + $0x78] sm:$0xf0]  ;;  %v3220_v25 = vld [vmem:[%s5788_s1 + $0x3cc] sm:$0xf0] }
  0x4c   :  { %1565 = vmatpush.bf16.msrb.mxu0 %v1323_v45  ;;  %v3296_v45 = vld [vmem:[%s5788_s1 + $0x46c] sm:$0xf0]  ;;  %v1335_v46 = vand.u32 %v4090_v13, %v1095_v34  ;;  %v3856_v34 = vld [vmem:[%s5788_s1 + $0x278] sm:$0xf0] }
  0x4d   :  { %1551 = vmatpush.bf16.msrb.mxu1 %v2947_v48  ;;  %v3123_v48 = vor.u32 %v3865_v38, %v3120_v39  ;;  %v3299_v57 = vor.u32 %v3908_v43, %v3296_v45  ;;  %v3386_v38 = vld [vmem:[%s5788_s1 + $0x4c8] sm:$0xf]  ;;  %v3940_v39 = vld [vmem:[%s5788_s1 + $0x518] sm:$0xf0]  ;;  %v2787_v43 = vor.u32 %v3781_v30, %v2784_v31  ;;  %v3931_v30 = vld [vmem:[%s5788_s1 + $0x4d4] sm:$0xf] }
  0x4e   :  { %1523 = vmatpush.bf16.msra.mxu3 %v3111_v37  ;;  %1572 = vmatpush.bf16.msrb.mxu2 %v3371_v49  ;;  %v1326_v37 = vand.u32 %v4090_v13, %v1092_v26  ;;  %v2950_v49 = vld [vmem:[%s5788_s1 + $0x170] sm:$0xf]  ;;  %v3126_v26 = vld [vmem:[%s5788_s1 + $0x2c8] sm:$0xf]  ;;  %v234_v45 = vld [vmem:[%s5788_s1 + $0x618] sm:$0x11]  ;;  %v3387_v47 = vor.u32 %v3940_v39, %v3386_v38 }
  0x4f   :  { %v2951_v60 = vor.u32 %v3833_v50, %v2950_v49  ;;  %v3950_v49 = vld [vmem:[%s5788_s1 + $0x56c] sm:$0xf]  ;;  %v3396_v31 = vld [vmem:[%s5788_s1 + $0x524] sm:$0xf0] }
  0x50   :  { %1566 = vmatpush.bf16.msrb.mxu0 %v3451_v63  ;;  %v3918_v63 = vld [vmem:[%s5788_s1 + $0x468] sm:$0xf0]  ;;  %v3399_v39 = vor.u32 %v3931_v30, %v3396_v31  ;;  %v3478_v30 = vld [vmem:[%s5788_s1 + $0x578] sm:$0xf] }
  0x51   :  { %1552 = vmatpush.bf16.msrb.mxu1 %v2863_v0  ;;  %v3295_v7 = vor.u32 %v3918_v63, %v3294_v62  ;;  %v3388_v62 = vld [vmem:[%s5788_s1 + $0x51c] sm:$0xf0]  ;;  %v3962_v31 = vld [vmem:[%s5788_s1 + $0x5c8] sm:$0xf0] }
  0x52   :  { %1524 = vmatpush.bf16.msra.mxu3 %v3027_v54  ;;  %1573 = vmatpush.bf16.msrb.mxu2 %v3287_v1  ;;  %v3036_v54 = vld [vmem:[%s5788_s1 + $0x26c] sm:$0xf0]  ;;  %v2866_v1 = vld [vmem:[%s5788_s1 + $0xc8] sm:$0xf] }
  0x53   :  { %v3039_v0 = vor.u32 %v3844_v53, %v3036_v54  ;;  %v2867_v9 = vor.u32 %v3812_v2, %v2866_v1  ;;  %v3464_v53 = vld [vmem:[%s5788_s1 + $0x5bc] sm:$0xf0] }
  0x54   :  { %1598 = vmatpush.bf16.msra.mxu0 %v3375_v5  ;;  %v2952_v5 = vld [vmem:[%s5788_s1 + $0x1c4] sm:$0xf0]  ;;  %v3302_v54 = vld [vmem:[%s5788_s1 + $0x420] sm:$0xf]  ;;  %v3467_v63 = vor.u32 %v3950_v49, %v3464_v53  ;;  %v3835_v49 = vld [vmem:[%s5788_s1 + $0x1d0] sm:$0xf0] }
  0x55   :  { %1553 = vmatpush.bf16.msrb.mxu1 %v2779_v15  ;;  %3510 = vmatmul.msk.bf16.vlgmr.msra.gmra.mxu2 %vm1294_vm1, %v4164_v51  ;;  %v2782_v15 = vld [vmem:[%s5788_s1 + $0x20] sm:$0xf] }
  0x56   :  { %1525 = vmatpush.bf16.msra.mxu3 %v2943_v4  ;;  %1574 = vmatpush.bf16.msrb.mxu2 %v3203_v16  ;;  %v3823_v4 = vld [vmem:[%s5788_s1 + $0x174] sm:$0xf] }
  0x57   :  { %v2955_v14 = vor.u32 %v3823_v4, %v2952_v5  ;;  %v3791_v16 = vld [vmem:[%s5788_s1 + $0x70] sm:$0xf0]  ;;  %v3218_v4 = vld [vmem:[%s5788_s1 + $0x378] sm:$0xf]  ;;  %v3898_v5 = vld [vmem:[%s5788_s1 + $0x3c8] sm:$0xf0] }
  0x58   :  { %1599 = vmatpush.bf16.msra.mxu0 %v3291_v18  ;;  %1554 = vmatmul.bf16.vlgmr.msrb.gmra.mxu1 %v4298_v56  ;;  %v3802_v18 = vld [vmem:[%s5788_s1 + $0xcc] sm:$0xf]  ;;  %v2783_v24 = vor.u32 %v3791_v16, %v2782_v15  ;;  %v3219_v15 = vor.u32 %v3898_v5, %v3218_v4  ;;  %v3825_v5 = vld [vmem:[%s5788_s1 + $0x184] sm:$0xf] }
  0x59   :  { %1617 = vmatpush.bf16.msra.mxu1 %v1329_v22  ;;  %v3211_v22 = vor.u32 %v3897_v12, %v3210_v11  ;;  %v2871_v28 = vor.u32 %v3802_v18, %v2868_v19  ;;  %v3909_v11 = vld [vmem:[%s5788_s1 + $0x424] sm:$0xf]  ;;  %v3304_v12 = vld [vmem:[%s5788_s1 + $0x474] sm:$0xf0]  ;;  %v3134_v18 = vld [vmem:[%s5788_s1 + $0x2d0] sm:$0xf] }
  0x5a   :  { %1526 = vmatpush.bf16.msra.mxu3 %v2859_v17  ;;  %1575 = vmatpush.bf16.msrb.mxu2 %v3119_v29  ;;  %v1094_v17 = vpack.c.b16 %v884_v3, %v884_v3  ;;  %v3782_v3 = vld [vmem:[%s5788_s1 + $0x2c] sm:$0xf]  ;;  %v3877_v19 = vld [vmem:[%s5788_s1 + $0x320] sm:$0xf0]  ;;  %v3307_v20 = vor.u32 %v3909_v11, %v3304_v12  ;;  %v3226_v11 = vld [vmem:[%s5788_s1 + $0x380] sm:$0xf] }
  0x5b   :  { %3511 = vmatmul.msk.bf16.vlgmr.msrb.gmra.mxu0 %vm1294_vm1, %v4164_v51  ;;  %v3899_v12 = vld [vmem:[%s5788_s1 + $0x3d0] sm:$0xf0] }
  0x5c   :  { %1600 = vmatpush.bf16.msra.mxu0 %v3207_v33  ;;  %v1332_v29 = vand.u32 %v4090_v13, %v1094_v17  ;;  %v3960_v33 = vld [vmem:[%s5788_s1 + $0x5b8] sm:$0xf0] }
  0x5d   :  { %1618 = vmatpush.bf16.msra.mxu1 %v3459_v36  ;;  %v3127_v36 = vor.u32 %v3876_v27, %v3126_v26  ;;  %v3951_v26 = vld [vmem:[%s5788_s1 + $0x574] sm:$0xf]  ;;  %v3472_v27 = vld [vmem:[%s5788_s1 + $0x5c4] sm:$0xf0] }
  0x5e   :  { %1527 = vmatpush.bf16.msra.mxu3 %v2775_v32  ;;  %1576 = vmatpush.bf16.msrb.mxu2 %v3035_v44  ;;  %v3462_v32 = vld [vmem:[%s5788_s1 + $0x568] sm:$0xf] }
  0x5f   :  { %v3463_v44 = vor.u32 %v3960_v33, %v3462_v32  ;;  %v3050_v33 = vld [vmem:[%s5788_s1 + $0x228] sm:$0xf] }
  0x60   :  { %1601 = vmatpush.bf16.msra.mxu0 %v3123_v48  ;;  %v3803_v48 = vld [vmem:[%s5788_s1 + $0xd4] sm:$0xf] }
  0x61   :  { %1650 = vmatpush.bf16.msrb.mxu1 %v3383_v40  ;;  %1528 = vmatmul.bf16.vlgmr.msra.gmra.mxu3 %v4298_v56  ;;  %v2960_v40 = vld [vmem:[%s5788_s1 + $0x1cc] sm:$0xf0] }
  0x62   :  { %1591 = vmatpush.bf16.msrb.mxu3 %v1326_v37  ;;  %1577 = vmatpush.bf16.msrb.mxu2 %v2951_v60  ;;  %v3824_v37 = vld [vmem:[%s5788_s1 + $0x17c] sm:$0xf]  ;;  %v887_v60 = vunpack.c.h.b16 %v234_v45 }
  0x63   :  { %v2963_v50 = vor.u32 %v3824_v37, %v2960_v40  ;;  %v3867_v37 = vld [vmem:[%s5788_s1 + $0x2d4] sm:$0xf]  ;;  %v3136_v40 = vld [vmem:[%s5788_s1 + $0x324] sm:$0xf0] }
  0x64   :  { %1602 = vmatpush.bf16.msra.mxu0 %v3039_v0  ;;  %v3303_v0 = vor.u32 %v3919_v55, %v3302_v54  ;;  %v1097_v10 = vpack.c.b16 %v887_v60, %v887_v60  ;;  %v3846_v55 = vld [vmem:[%s5788_s1 + $0x22c] sm:$0xf]  ;;  %v3889_v60 = vld [vmem:[%s5788_s1 + $0x384] sm:$0xf] }
  0x65   :  { %1651 = vmatpush.bf16.msrb.mxu1 %v3299_v57  ;;  %v2876_v57 = vld [vmem:[%s5788_s1 + $0x124] sm:$0xf0] }
  0x66   :  { %1592 = vmatpush.bf16.msrb.mxu3 %v3455_v52  ;;  %1578 = vmatpush.bf16.msrb.mxu2 %v2867_v9  ;;  %v3043_v52 = vor.u32 %v3855_v42, %v3042_v41  ;;  %v2879_v1 = vor.u32 %v3803_v48, %v2876_v57  ;;  %v3813_v9 = vld [vmem:[%s5788_s1 + $0x120] sm:$0xf0]  ;;  %v3470_v41 = vld [vmem:[%s5788_s1 + $0x570] sm:$0xf]  ;;  %v2966_v48 = vld [vmem:[%s5788_s1 + $0x180] sm:$0xf] }
  0x67   :  { %v2875_v17 = vor.u32 %v3813_v9, %v2874_v8  ;;  %v3961_v42 = vld [vmem:[%s5788_s1 + $0x5c0] sm:$0xf0]  ;;  %v3052_v57 = vld [vmem:[%s5788_s1 + $0x27c] sm:$0xf0]  ;;  %v3868_v9 = vld [vmem:[%s5788_s1 + $0x2dc] sm:$0xf] }
  0x68   :  { %1603 = vmatpush.bf16.msra.mxu0 %v2955_v14  ;;  %3513 = vmatmul.msk.bf16.vlgmr.msra.gmra.mxu1 %vm1294_vm1, %v4164_v51  ;;  %v886_v14 = vunpack.c.l.b16 %v234_v45  ;;  %v3312_v45 = vld [vmem:[%s5788_s1 + $0x47c] sm:$0xf0]  ;;  %v3471_v53 = vor.u32 %v3961_v42, %v3470_v41  ;;  %v3942_v41 = vld [vmem:[%s5788_s1 + $0x528] sm:$0xf0]  ;;  %v3058_v42 = vld [vmem:[%s5788_s1 + $0x230] sm:$0xf] }
  0x69   :  { %1652 = vmatpush.bf16.msrb.mxu1 %v3215_v6  ;;  %v3391_v6 = vor.u32 %v3930_v61, %v3388_v62  ;;  %v3228_v61 = vld [vmem:[%s5788_s1 + $0x3d4] sm:$0xf0]  ;;  %v3310_v62 = vld [vmem:[%s5788_s1 + $0x428] sm:$0xf] }
  0x6a   :  { %1624 = vmatpush.bf16.msra.mxu3 %v3379_v58  ;;  %1579 = vmatpush.bf16.msrb.mxu2 %v2783_v24  ;;  %v2958_v58 = vld [vmem:[%s5788_s1 + $0x178] sm:$0xf]  ;;  %v3888_v24 = vld [vmem:[%s5788_s1 + $0x37c] sm:$0xf]  ;;  %v3231_v4 = vor.u32 %v3889_v60, %v3228_v61 }
  0x6b   :  { %v2959_v2 = vor.u32 %v3834_v59, %v2958_v58  ;;  %v2967_v59 = vor.u32 %v3835_v49, %v2966_v48  ;;  %v3805_v48 = vld [vmem:[%s5788_s1 + $0xe4] sm:$0xf]  ;;  %v2892_v49 = vld [vmem:[%s5788_s1 + $0x134] sm:$0xf0]  ;;  %v3932_v61 = vld [vmem:[%s5788_s1 + $0x4dc] sm:$0xf] }
  0x6c   :  { %1604 = vmatpush.bf16.msra.mxu0 %v2871_v28  ;;  %v1096_v28 = vpack.c.b16 %v886_v14, %v886_v14  ;;  %v2798_v14 = vld [vmem:[%s5788_s1 + $0x30] sm:$0xf] }
  0x6d   :  { %1653 = vmatpush.bf16.msrb.mxu1 %v3131_v21  ;;  %1580 = vmatmul.bf16.vlgmr.msrb.gmra.mxu2 %v4298_v56  ;;  %v1341_v21 = vand.u32 %v4090_v13, %v1097_v10  ;;  %v3144_v10 = vld [vmem:[%s5788_s1 + $0x32c] sm:$0xf0] }
  0x6e   :  { %1625 = vmatpush.bf16.msra.mxu3 %v3295_v7  ;;  %1643 = vmatpush.bf16.msra.mxu2 %v1332_v29  ;;  %v2792_v7 = vld [vmem:[%s5788_s1 + $0x7c] sm:$0xf0]  ;;  %v3135_v29 = vor.u32 %v3877_v19, %v3134_v18  ;;  %v1338_v38 = vand.u32 %v4090_v13, %v1096_v28  ;;  %v3147_v18 = vor.u32 %v3868_v9, %v3144_v10  ;;  %v3804_v19 = vld [vmem:[%s5788_s1 + $0xdc] sm:$0xf]  ;;  %v3878_v28 = vld [vmem:[%s5788_s1 + $0x328] sm:$0xf0] }
  0x6f   :  { %v2795_v16 = vor.u32 %v3782_v3, %v2792_v7  ;;  %v3055_v3 = vor.u32 %v3846_v55, %v3052_v57  ;;  %v3318_v55 = vld [vmem:[%s5788_s1 + $0x430] sm:$0xf]  ;;  %v3921_v57 = vld [vmem:[%s5788_s1 + $0x480] sm:$0xf0]  ;;  %v3815_v9 = vld [vmem:[%s5788_s1 + $0x130] sm:$0xf0] }
  0x70   :  { %1605 = vmatpush.bf16.msra.mxu0 %v2787_v43  ;;  %v3051_v43 = vor.u32 %v3856_v34, %v3050_v33  ;;  %v3783_v33 = vld [vmem:[%s5788_s1 + $0x34] sm:$0xf]  ;;  %v2800_v34 = vld [vmem:[%s5788_s1 + $0x84] sm:$0xf0] }
  0x71   :  { %1654 = vmatpush.bf16.msrb.mxu1 %v3047_v35  ;;  %3512 = vmatmul.msk.bf16.vlgmr.msrb.gmra.mxu3 %vm1294_vm1, %v4164_v51  ;;  %v3223_v35 = vor.u32 %v3888_v24, %v3220_v25  ;;  %v3847_v24 = vld [vmem:[%s5788_s1 + $0x234] sm:$0xf]  ;;  %v3060_v25 = vld [vmem:[%s5788_s1 + $0x284] sm:$0xf0] }
  0x72   :  { %1626 = vmatpush.bf16.msra.mxu3 %v3211_v22  ;;  %1644 = vmatpush.bf16.msra.mxu2 %v3463_v44  ;;  %v2790_v22 = vld [vmem:[%s5788_s1 + $0x28] sm:$0xf]  ;;  %v3910_v44 = vld [vmem:[%s5788_s1 + $0x42c] sm:$0xf] }
  0x73   :  { %1606 = vmatmul.bf16.vlgmr.msra.gmra.mxu0 %v4298_v56  ;;  %v2791_v32 = vor.u32 %v3792_v23, %v2790_v22  ;;  %v3315_v54 = vor.u32 %v3910_v44, %v3312_v45  ;;  %v3227_v22 = vor.u32 %v3899_v12, %v3226_v11  ;;  %v2803_v44 = vor.u32 %v3783_v33, %v2800_v34  ;;  %v236_v45 = vld [vmem:[%s5788_s1 + $0x628] sm:$0x11]  ;;  %v3911_v11 = vld [vmem:[%s5788_s1 + $0x434] sm:$0xf] }
  0x74   :  { %1669 = vmatpush.bf16.msrb.mxu0 %v1335_v46  ;;  %v3394_v46 = vld [vmem:[%s5788_s1 + $0x4d0] sm:$0xf]  ;;  %v891_v60 = vunpack.c.h.b16 %v236_v45  ;;  %v3320_v12 = vld [vmem:[%s5788_s1 + $0x484] sm:$0xf0] }
  0x75   :  { %1655 = vmatpush.bf16.msrb.mxu1 %v2963_v50  ;;  %v3139_v50 = vor.u32 %v3867_v37, %v3136_v40  ;;  %v3826_v37 = vld [vmem:[%s5788_s1 + $0x18c] sm:$0xf]  ;;  %v3479_v40 = vor.u32 %v3962_v31, %v3478_v30  ;;  %v3933_v30 = vld [vmem:[%s5788_s1 + $0x4e4] sm:$0xf]  ;;  %v3412_v31 = vld [vmem:[%s5788_s1 + $0x534] sm:$0xf0] }
  0x76   :  { %1627 = vmatpush.bf16.msra.mxu3 %v3127_v36  ;;  %1676 = vmatpush.bf16.msrb.mxu2 %v3387_v47  ;;  %v3475_v36 = vor.u32 %v3951_v26, %v3472_v27  ;;  %v3941_v47 = vld [vmem:[%s5788_s1 + $0x520] sm:$0xf0]  ;;  %v3142_v27 = vld [vmem:[%s5788_s1 + $0x2d8] sm:$0xf]  ;;  %v1101_v10 = vpack.c.b16 %v891_v60, %v891_v60  ;;  %v5141_v60 = vld [vmem:[%s5788_s1 + $0x630] sm:$0x11] }
  0x77   :  { %v3395_v58 = vor.u32 %v3941_v47, %v3394_v46 }
  0x78   :  { %1670 = vmatpush.bf16.msrb.mxu0 %v3467_v63  ;;  %v3920_v63 = vld [vmem:[%s5788_s1 + $0x478] sm:$0xf0] }
  0x79   :  { %1656 = vmatpush.bf16.msrb.mxu1 %v2879_v1  ;;  %v3814_v1 = vld [vmem:[%s5788_s1 + $0x128] sm:$0xf0]  ;;  %v3311_v7 = vor.u32 %v3920_v63, %v3310_v62  ;;  %v3404_v62 = vld [vmem:[%s5788_s1 + $0x52c] sm:$0xf0]  ;;  %v2895_v63 = vor.u32 %v3805_v48, %v2892_v49  ;;  %v3410_v48 = vld [vmem:[%s5788_s1 + $0x4e0] sm:$0xf] }
  0x7a   :  { %1628 = vmatpush.bf16.msra.mxu3 %v3043_v52  ;;  %1677 = vmatpush.bf16.msrb.mxu2 %v3303_v0  ;;  %v4889_v52 = vld [vmem:[%s5788_s1 + $0x620] sm:$0x11]  ;;  %v2882_v0 = vld [vmem:[%s5788_s1 + $0xd8] sm:$0xf]  ;;  %v3943_v49 = vld [vmem:[%s5788_s1 + $0x530] sm:$0xf0] }
  0x7b   :  { %v2883_v8 = vor.u32 %v3814_v1, %v2882_v0  ;;  %v3319_v1 = vor.u32 %v3921_v57, %v3318_v55 }
  0x7c   :  { %1702 = vmatpush.bf16.msra.mxu0 %v3391_v6  ;;  %v2968_v6 = vld [vmem:[%s5788_s1 + $0x1d4] sm:$0xf0] }
  0x7d   :  { %1657 = vmatpush.bf16.msrb.mxu1 %v2795_v16  ;;  %3514 = vmatmul.msk.bf16.vlgmr.msra.gmra.mxu2 %vm1294_vm1, %v4164_v51 }
  0x7e   :  { %1629 = vmatpush.bf16.msra.mxu3 %v2959_v2  ;;  %1678 = vmatpush.bf16.msrb.mxu2 %v3219_v15  ;;  %v888_v2 = vunpack.c.l.b16 %v4889_v52  ;;  %v3793_v15 = vld [vmem:[%s5788_s1 + $0x80] sm:$0xf0] }
  0x7f   :  { %v2799_v23 = vor.u32 %v3793_v15, %v2798_v14  ;;  %v890_v14 = vunpack.c.l.b16 %v236_v45  ;;  %v3912_v45 = vld [vmem:[%s5788_s1 + $0x43c] sm:$0xf] }
  0x80   :  { %1703 = vmatpush.bf16.msra.mxu0 %v3307_v20  ;;  %1658 = vmatmul.bf16.vlgmr.msrb.gmra.mxu1 %v4298_v56  ;;  %v1098_v16 = vpack.c.b16 %v888_v2, %v888_v2  ;;  %v2884_v20 = vld [vmem:[%s5788_s1 + $0x12c] sm:$0xf0] }
  0x81   :  { %1721 = vmatpush.bf16.msra.mxu1 %v1341_v21  ;;  %v889_v21 = vunpack.c.h.b16 %v4889_v52 }
  0x82   :  { %1630 = vmatpush.bf16.msra.mxu3 %v2875_v17  ;;  %1679 = vmatpush.bf16.msrb.mxu2 %v3135_v29  ;;  %v2971_v17 = vor.u32 %v3825_v5, %v2968_v6  ;;  %v1344_v26 = vand.u32 %v4090_v13, %v1098_v16  ;;  %v2887_v29 = vor.u32 %v3804_v19, %v2884_v20  ;;  %v3234_v5 = vld [vmem:[%s5788_s1 + $0x388] sm:$0xf]  ;;  %v3879_v19 = vld [vmem:[%s5788_s1 + $0x330] sm:$0xf0] }
  0x83   :  { %3515 = vmatmul.msk.bf16.vlgmr.msrb.gmra.mxu0 %vm1294_vm1, %v4164_v51  ;;  %v3407_v6 = vor.u32 %v3932_v61, %v3404_v62  ;;  %v3411_v61 = vor.u32 %v3943_v49, %v3410_v48  ;;  %v3891_v62 = vld [vmem:[%s5788_s1 + $0x394] sm:$0xf] }
  0x84   :  { %1704 = vmatpush.bf16.msra.mxu0 %v3223_v35  ;;  %v1099_v35 = vpack.c.b16 %v889_v21, %v889_v21  ;;  %v3323_v21 = vor.u32 %v3911_v11, %v3320_v12  ;;  %v3870_v12 = vld [vmem:[%s5788_s1 + $0x2ec] sm:$0xf] }
  0x85   :  { %1722 = vmatpush.bf16.msra.mxu1 %v3475_v36  ;;  %v3143_v36 = vor.u32 %v3878_v28, %v3142_v27  ;;  %v3953_v27 = vld [vmem:[%s5788_s1 + $0x584] sm:$0xf]  ;;  %v3488_v28 = vld [vmem:[%s5788_s1 + $0x5d4] sm:$0xf0] }
  0x86   :  { %1631 = vmatpush.bf16.msra.mxu3 %v2791_v32  ;;  %1680 = vmatpush.bf16.msrb.mxu2 %v3051_v43  ;;  %v3063_v32 = vor.u32 %v3847_v24, %v3060_v25  ;;  %v3857_v43 = vld [vmem:[%s5788_s1 + $0x280] sm:$0xf0]  ;;  %v1347_v47 = vand.u32 %v4090_v13, %v1099_v35  ;;  %v3794_v24 = vld [vmem:[%s5788_s1 + $0x88] sm:$0xf0] }
  0x87   :  { %v3059_v52 = vor.u32 %v3857_v43, %v3058_v42  ;;  %v3890_v25 = vld [vmem:[%s5788_s1 + $0x38c] sm:$0xf]  ;;  %v3152_v42 = vld [vmem:[%s5788_s1 + $0x334] sm:$0xf0]  ;;  %v3486_v43 = vld [vmem:[%s5788_s1 + $0x580] sm:$0xf] }
  0x88   :  { %1705 = vmatpush.bf16.msra.mxu0 %v3139_v50 }
  0x89   :  { %1754 = vmatpush.bf16.msrb.mxu1 %v3399_v39  ;;  %1632 = vmatmul.bf16.vlgmr.msra.gmra.mxu3 %v4298_v56  ;;  %v3402_v39 = vld [vmem:[%s5788_s1 + $0x4d8] sm:$0xf] }
  0x8a   :  { %1695 = vmatpush.bf16.msrb.mxu3 %v1338_v38  ;;  %1681 = vmatpush.bf16.msrb.mxu2 %v2967_v59  ;;  %v2976_v38 = vld [vmem:[%s5788_s1 + $0x1dc] sm:$0xf0]  ;;  %v3403_v50 = vor.u32 %v3942_v41, %v3402_v39  ;;  %v3836_v59 = vld [vmem:[%s5788_s1 + $0x1d8] sm:$0xf0]  ;;  %v3869_v41 = vld [vmem:[%s5788_s1 + $0x2e4] sm:$0xf] }
  0x8b   :  { %v2979_v46 = vor.u32 %v3826_v37, %v2976_v38  ;;  %v3066_v37 = vld [vmem:[%s5788_s1 + $0x238] sm:$0xf]  ;;  %v3858_v38 = vld [vmem:[%s5788_s1 + $0x288] sm:$0xf0] }
  0x8c   :  { %1706 = vmatpush.bf16.msra.mxu0 %v3055_v3  ;;  %v3784_v3 = vld [vmem:[%s5788_s1 + $0x3c] sm:$0xf] }
  0x8d   :  { %1755 = vmatpush.bf16.msrb.mxu1 %v3315_v54  ;;  %v3480_v54 = vld [vmem:[%s5788_s1 + $0x5cc] sm:$0xf0]  ;;  %v5065_v20 = vpop.f32.mrf.mxu1 }
  0x8e   :  { %1696 = vmatpush.bf16.msrb.mxu3 %v3471_v53  ;;  %1682 = vmatpush.bf16.msrb.mxu2 %v2883_v8  ;;  %v3952_v53 = vld [vmem:[%s5788_s1 + $0x57c] sm:$0xf]  ;;  %v2890_v8 = vld [vmem:[%s5788_s1 + $0xe0] sm:$0xf] }
  0x8f   :  { %v3483_v0 = vor.u32 %v3952_v53, %v3480_v54  ;;  %v2982_v53 = vld [vmem:[%s5788_s1 + $0x190] sm:$0xf]  ;;  %v3837_v54 = vld [vmem:[%s5788_s1 + $0x1e0] sm:$0xf0] }
  0x90   :  { %1707 = vmatpush.bf16.msra.mxu0 %v2971_v17  ;;  %3517 = vmatmul.msk.bf16.vlgmr.msra.gmra.mxu1 %vm1294_vm1, %v4164_v51  ;;  %v2891_v17 = vor.u32 %v3815_v9, %v2890_v8  ;;  %v3827_v9 = vld [vmem:[%s5788_s1 + $0x194] sm:$0xf] }
  0x91   :  { %1756 = vmatpush.bf16.msrb.mxu1 %v3231_v4  ;;  %v2808_v4 = vld [vmem:[%s5788_s1 + $0x8c] sm:$0xf0] }
  0x92   :  { %1728 = vmatpush.bf16.msra.mxu3 %v3395_v58  ;;  %1683 = vmatpush.bf16.msrb.mxu2 %v2799_v23  ;;  %v2974_v58 = vld [vmem:[%s5788_s1 + $0x188] sm:$0xf]  ;;  %v2811_v15 = vor.u32 %v3784_v3, %v2808_v4  ;;  %v2806_v23 = vld [vmem:[%s5788_s1 + $0x38] sm:$0xf] }
  0x93   :  { %v2975_v2 = vor.u32 %v3836_v59, %v2974_v58  ;;  %v2807_v33 = vor.u32 %v3794_v24, %v2806_v23  ;;  %v3848_v58 = vld [vmem:[%s5788_s1 + $0x23c] sm:$0xf]  ;;  %v3068_v59 = vld [vmem:[%s5788_s1 + $0x28c] sm:$0xf0] }
  0x94   :  { %1708 = vmatpush.bf16.msra.mxu0 %v2887_v29  ;;  %v1100_v29 = vpack.c.b16 %v890_v14, %v890_v14  ;;  %v5092_v34 = vpop.f32.mrf.mxu3  ;;  %v3071_v4 = vor.u32 %v3848_v58, %v3068_v59  ;;  %v3160_v14 = vld [vmem:[%s5788_s1 + $0x33c] sm:$0xf0]  ;;  %v3807_v59 = vld [vmem:[%s5788_s1 + $0xf4] sm:$0xf] }
  0x95   :  { %1757 = vmatpush.bf16.msrb.mxu1 %v3147_v18  ;;  %1684 = vmatmul.bf16.vlgmr.msrb.gmra.mxu2 %v4298_v56  ;;  %v3150_v18 = vld [vmem:[%s5788_s1 + $0x2e0] sm:$0xf]  ;;  %v3163_v24 = vor.u32 %v3870_v12, %v3160_v14  ;;  %v3250_v14 = vld [vmem:[%s5788_s1 + $0x398] sm:$0xf] }
  0x96   :  { %1729 = vmatpush.bf16.msra.mxu3 %v3311_v7  ;;  %1747 = vmatpush.bf16.msra.mxu2 %v1344_v26  ;;  %v3900_v7 = vld [vmem:[%s5788_s1 + $0x3d8] sm:$0xf0]  ;;  %v3236_v26 = vld [vmem:[%s5788_s1 + $0x3dc] sm:$0xf0]  ;;  %v1350_v39 = vand.u32 %v4090_v13, %v1100_v29  ;;  %v3076_v29 = vld [vmem:[%s5788_s1 + $0x294] sm:$0xf0] }
  0x97   :  { %v3235_v16 = vor.u32 %v3900_v7, %v3234_v5  ;;  %v3239_v35 = vor.u32 %v3890_v25, %v3236_v26  ;;  %v2898_v5 = vld [vmem:[%s5788_s1 + $0xe8] sm:$0xf]  ;;  %v892_v7 = vunpack.c.l.b16 %v5141_v60  ;;  %v3806_v25 = vld [vmem:[%s5788_s1 + $0xec] sm:$0xf]  ;;  %v2900_v26 = vld [vmem:[%s5788_s1 + $0x13c] sm:$0xf0] }
  0x98   :  { %1709 = vmatpush.bf16.msra.mxu0 %v2803_v44  ;;  %v3963_v44 = vld [vmem:[%s5788_s1 + $0x5d0] sm:$0xf0]  ;;  %v2824_v12 = vld [vmem:[%s5788_s1 + $0x9c] sm:$0xf0] }
  0x99   :  { %1758 = vmatpush.bf16.msrb.mxu1 %v3063_v32  ;;  %3516 = vmatmul.msk.bf16.vlgmr.msrb.gmra.mxu3 %vm1294_vm1, %v4164_v51  ;;  %v3151_v32 = vor.u32 %v3879_v19, %v3150_v18  ;;  %v3487_v55 = vor.u32 %v3963_v44, %v3486_v43  ;;  %v2814_v19 = vld [vmem:[%s5788_s1 + $0x40] sm:$0xf]  ;;  %v3828_v43 = vld [vmem:[%s5788_s1 + $0x19c] sm:$0xf] }
  0x9a   :  { %1730 = vmatpush.bf16.msra.mxu3 %v3227_v22  ;;  %1748 = vmatpush.bf16.msra.mxu2 %v3479_v40  ;;  %v1353_v22 = vand.u32 %v4090_v13, %v1101_v10  ;;  %v3415_v40 = vor.u32 %v3933_v30, %v3412_v31  ;;  %v2984_v10 = vld [vmem:[%s5788_s1 + $0x1e4] sm:$0xf0]  ;;  %v893_v30 = vunpack.c.h.b16 %v5141_v60 }
  0x9b   :  { %1710 = vmatmul.bf16.vlgmr.msra.gmra.mxu0 %v4298_v56  ;;  %v2987_v18 = vor.u32 %v3827_v9, %v2984_v10  ;;  %v2908_v60 = vld [vmem:[%s5788_s1 + $0x144] sm:$0xf0]  ;;  %v3786_v10 = vld [vmem:[%s5788_s1 + $0x4c] sm:$0xf] }
  0x9c   :  { %1773 = vmatpush.bf16.msrb.mxu0 %v1347_v47  ;;  %v3067_v47 = vor.u32 %v3858_v38, %v3066_v37  ;;  %v1414_v3 = vpop.f32.mrf.mxu3  ;;  %v3785_v38 = vld [vmem:[%s5788_s1 + $0x44] sm:$0xf]  ;;  %v1103_v48 = vpack.c.b16 %v893_v30, %v893_v30  ;;  %v2822_v30 = vld [vmem:[%s5788_s1 + $0x48] sm:$0xf] }
  0x9d   :  { %1759 = vmatpush.bf16.msrb.mxu1 %v2979_v46  ;;  %v3328_v46 = vld [vmem:[%s5788_s1 + $0x48c] sm:$0xf0]  ;;  %v3838_v3 = vld [vmem:[%s5788_s1 + $0x1e8] sm:$0xf0] }
  0x9e   :  { %1731 = vmatpush.bf16.msra.mxu3 %v3143_v36  ;;  %1780 = vmatpush.bf16.msrb.mxu2 %v3403_v50  ;;  %v3491_v36 = vor.u32 %v3953_v27, %v3488_v28  ;;  %v1388_v50 = vpop.f32.mrf.mxu1  ;;  %v3331_v57 = vor.u32 %v3912_v45, %v3328_v46  ;;  %v3849_v28 = vld [vmem:[%s5788_s1 + $0x244] sm:$0xf]  ;;  %v2992_v45 = vld [vmem:[%s5788_s1 + $0x1ec] sm:$0xf0]  ;;  %v3418_v46 = vld [vmem:[%s5788_s1 + $0x4e8] sm:$0xf] }
  0x9f   :  { %v3074_v50 = vld [vmem:[%s5788_s1 + $0x240] sm:$0xf] }
  0xa0   :  { %1774 = vmatpush.bf16.msrb.mxu0 %v3483_v0  ;;  %v2983_v0 = vor.u32 %v3837_v54, %v2982_v53  ;;  %v5191_v23 = vpop.f32.mrf.mxu0 }
  0xa1   :  { %1760 = vmatpush.bf16.msrb.mxu1 %v2895_v63  ;;  %v3244_v63 = vld [vmem:[%s5788_s1 + $0x3e4] sm:$0xf0] }
  0xa2   :  { %1732 = vmatpush.bf16.msra.mxu3 %v3059_v52  ;;  %1781 = vmatpush.bf16.msrb.mxu2 %v3319_v1  ;;  %v3155_v52 = vor.u32 %v3869_v41, %v3152_v42  ;;  %v3326_v1 = vld [vmem:[%s5788_s1 + $0x438] sm:$0xf]  ;;  %v3247_v8 = vor.u32 %v3891_v62, %v3244_v63  ;;  %v3494_v41 = vld [vmem:[%s5788_s1 + $0x588] sm:$0xf]  ;;  %v3964_v42 = vld [vmem:[%s5788_s1 + $0x5d8] sm:$0xf0] }
  0xa3   :  { %v3495_v54 = vor.u32 %v3964_v42, %v3494_v41  ;;  %v3334_v62 = vld [vmem:[%s5788_s1 + $0x440] sm:$0xf]  ;;  %v3923_v63 = vld [vmem:[%s5788_s1 + $0x490] sm:$0xf0]  ;;  %v3082_v41 = vld [vmem:[%s5788_s1 + $0x248] sm:$0xf] }
  0xa4   :  { %1806 = vmatpush.bf16.msra.mxu0 %v3407_v6  ;;  %v3816_v6 = vld [vmem:[%s5788_s1 + $0x138] sm:$0xf0]  ;;  %v3335_v9 = vor.u32 %v3923_v63, %v3334_v62  ;;  %v2830_v63 = vld [vmem:[%s5788_s1 + $0x50] sm:$0xf] }
  0xa5   :  { %1761 = vmatpush.bf16.msrb.mxu1 %v2811_v15  ;;  %3518 = vmatmul.msk.bf16.vlgmr.msra.gmra.mxu2 %vm1294_vm1, %v4164_v51  ;;  %v2899_v15 = vor.u32 %v3816_v6, %v2898_v5  ;;  %v3496_v5 = vld [vmem:[%s5788_s1 + $0x5dc] sm:$0xf0]  ;;  %v3860_v42 = vld [vmem:[%s5788_s1 + $0x298] sm:$0xf0] }
  0xa6   :  { %1733 = vmatpush.bf16.msra.mxu3 %v2975_v2  ;;  %1782 = vmatpush.bf16.msrb.mxu2 %v3235_v16  ;;  %v3922_v2 = vld [vmem:[%s5788_s1 + $0x488] sm:$0xf0]  ;;  %v3242_v16 = vld [vmem:[%s5788_s1 + $0x390] sm:$0xf] }
  0xa7   :  { %v3327_v11 = vor.u32 %v3922_v2, %v3326_v1  ;;  %v1359_v1 = vand.u32 %v4090_v13, %v1103_v48 }
  0xa8   :  { %1807 = vmatpush.bf16.msra.mxu0 %v3323_v21  ;;  %1762 = vmatmul.bf16.vlgmr.msrb.gmra.mxu1 %v4298_v56  ;;  %v3795_v21 = vld [vmem:[%s5788_s1 + $0x90] sm:$0xf0]  ;;  %v5241_v49 = vpop.f32.mrf.mxu2 }
  0xa9   :  { %1825 = vmatpush.bf16.msra.mxu1 %v1353_v22  ;;  %v1102_v22 = vpack.c.b16 %v892_v7, %v892_v7  ;;  %v2815_v31 = vor.u32 %v3795_v21, %v2814_v19  ;;  %v238_v7 = vld [vmem:[%s5788_s1 + $0x638] sm:$0x1] }
  0xaa   :  { %1734 = vmatpush.bf16.msra.mxu3 %v2891_v17  ;;  %1783 = vmatpush.bf16.msrb.mxu2 %v3151_v32  ;;  %v3901_v17 = vld [vmem:[%s5788_s1 + $0x3e0] sm:$0xf0]  ;;  %v3158_v32 = vld [vmem:[%s5788_s1 + $0x2e8] sm:$0xf]  ;;  %v894_v19 = vunpack.c.l.b16 %v238_v7 }
  0xab   :  { %3519 = vmatmul.msk.bf16.vlgmr.msrb.gmra.mxu0 %vm1294_vm1, %v4164_v51  ;;  %v3243_v27 = vor.u32 %v3901_v17, %v3242_v16  ;;  %v1356_v37 = vand.u32 %v4090_v13, %v1102_v22  ;;  %v2906_v17 = vld [vmem:[%s5788_s1 + $0xf0] sm:$0xf]  ;;  %v5304_v22 = vld [vmem:[%s5790_s4 + $0x38] sm:$0xff] }
  0xac   :  { %1808 = vmatpush.bf16.msra.mxu0 %v3239_v35  ;;  %v5212_v35 = vpop.f32.mrf.mxu3 }
  0xad   :  { %1826 = vmatpush.bf16.msra.mxu1 %v3491_v36  ;;  %v2903_v36 = vor.u32 %v3806_v25, %v2900_v26  ;;  %v5268_v2 = vpop.f32.mrf.mxu1 }
  0xae   :  { %1735 = vmatpush.bf16.msra.mxu3 %v2807_v33  ;;  %1784 = vmatpush.bf16.msrb.mxu2 %v3067_v47  ;;  %v3880_v33 = vld [vmem:[%s5788_s1 + $0x338] sm:$0xf0] }
  0xaf   :  { %v3159_v44 = vor.u32 %v3880_v33, %v3158_v32  ;;  %v3944_v47 = vld [vmem:[%s5788_s1 + $0x538] sm:$0xf0]  ;;  %v1104_v33 = vpack.c.b16 %v894_v19, %v894_v19 }
  0xb0   :  { %1809 = vmatpush.bf16.msra.mxu0 %v3155_v52  ;;  %v3859_v52 = vld [vmem:[%s5788_s1 + $0x290] sm:$0xf0]  ;;  %v3419_v58 = vor.u32 %v3944_v47, %v3418_v46  ;;  %v1401_v21 = vpop.f32.mrf.mxu2  ;;  %v3965_v46 = vld [vmem:[%s5788_s1 + $0x5e0] sm:$0xf0]  ;;  %v3083_v47 = vor.u32 %v3860_v42, %v3082_v41 }
  0xb1   :  { %1858 = vmatpush.bf16.msrb.mxu1 %v3415_v40  ;;  %1736 = vmatmul.bf16.vlgmr.msra.gmra.mxu3 %v4298_v56  ;;  %v3079_v40 = vor.u32 %v3849_v28, %v3076_v29  ;;  %v3166_v28 = vld [vmem:[%s5788_s1 + $0x2f0] sm:$0xf]  ;;  %v3881_v29 = vld [vmem:[%s5788_s1 + $0x340] sm:$0xf0] }
  0xb2   :  { %1799 = vmatpush.bf16.msrb.mxu3 %v1350_v39  ;;  %1785 = vmatpush.bf16.msrb.mxu2 %v2983_v0  ;;  %v2816_v39 = vld [vmem:[%s5788_s1 + $0x94] sm:$0xf0]  ;;  %v5438_v21 = vld [vmem:[%s5791_s3 + $0x10] sm:$0xff] }
  0xb3   :  { %v2819_v53 = vor.u32 %v3785_v38, %v2816_v39  ;;  %v2990_v0 = vld [vmem:[%s5788_s1 + $0x198] sm:$0xf]  ;;  %v3167_v38 = vor.u32 %v3881_v29, %v3166_v28 }
  0xb4   :  { %1810 = vmatpush.bf16.msra.mxu0 %v3071_v4  ;;  %v3954_v4 = vld [vmem:[%s5788_s1 + $0x58c] sm:$0xf]  ;;  %v1440_v6 = vpop.f32.mrf.mxu3 }
  0xb5   :  { %1859 = vmatpush.bf16.msrb.mxu1 %v3331_v57  ;;  %v2995_v57 = vor.u32 %v3828_v43, %v2992_v45  ;;  %v3499_v16 = vor.u32 %v3954_v4, %v3496_v5  ;;  %v1427_v32 = vpop.f32.mrf.mxu1  ;;  %v1915_v43 = vld [vmem:[%s5790_s4 + $0x8] sm:$0xff]  ;;  %v3502_v45 = vld [vmem:[%s5788_s1 + $0x590] sm:$0xf]  ;;  %v5393_v5 = vld [vmem:[%s5791_s3] sm:$0xff] }
  0xb6   :  { %1800 = vmatpush.bf16.msrb.mxu3 %v3487_v55  ;;  %1786 = vmatpush.bf16.msrb.mxu2 %v2899_v15  ;;  %v1375_v55 = vpop.f32.mrf.mxu0  ;;  %v3902_v15 = vld [vmem:[%s5788_s1 + $0x3e8] sm:$0xf0] }
  0xb7   :  { %v3251_v25 = vor.u32 %v3902_v15, %v3250_v14  ;;  %v1923_v55 = vld [vmem:[%s5790_s4 + $0x48] sm:$0xff]  ;;  %v1924_v14 = vld [vmem:[%s5790_s4 + $0x50] sm:$0xff] }
  0xb8   :  { %1811 = vmatpush.bf16.msra.mxu0 %v2987_v18  ;;  %3521 = vmatmul.msk.bf16.vlgmr.msra.gmra.mxu1 %vm1294_vm1, %v4164_v51  ;;  %v3817_v18 = vld [vmem:[%s5788_s1 + $0x140] sm:$0xf0]  ;;  %v5464_v32 = vld [vmem:[%s5792_s2 + $0x8] sm:$0xff] }
  0xb9   :  { %1860 = vmatpush.bf16.msrb.mxu1 %v3247_v8  ;;  %v2911_v8 = vor.u32 %v3807_v59, %v2908_v60  ;;  %v3818_v59 = vld [vmem:[%s5788_s1 + $0x148] sm:$0xf0]  ;;  %v1916_v60 = vld [vmem:[%s5790_s4 + $0x10] sm:$0xff] }
  0xba   :  { %1832 = vmatpush.bf16.msra.mxu3 %v3411_v61  ;;  %1787 = vmatpush.bf16.msrb.mxu2 %v2815_v31  ;;  %v3075_v61 = vor.u32 %v3859_v52, %v3074_v50  ;;  %v3796_v31 = vld [vmem:[%s5788_s1 + $0x98] sm:$0xf0]  ;;  %v3839_v50 = vld [vmem:[%s5788_s1 + $0x1f0] sm:$0xf0]  ;;  %v3503_v52 = vor.u32 %v3965_v46, %v3502_v45 }
  0xbc   :  { %1812 = vmatpush.bf16.msra.mxu0 %v2903_v36  ;;  %v1922_v36 = vld [vmem:[%s5790_s4 + $0x40] sm:$0xff]  ;;  %v5329_v39 = vpop.f32.mrf.mxu3 }
  0xbd   :  { %1861 = vmatpush.bf16.msrb.mxu1 %v3163_v24  ;;  %1788 = vmatmul.bf16.vlgmr.msrb.gmra.mxu2 %v4298_v56  ;;  %v2827_v24 = vor.u32 %v3786_v10, %v2824_v12  ;;  %v1919_v10 = vld [vmem:[%s5790_s4 + $0x28] sm:$0xff] }
  0xbe   :  { %1833 = vmatpush.bf16.msra.mxu3 %v3327_v11  ;;  %1851 = vmatpush.bf16.msra.mxu2 %v1356_v37  ;;  %v2991_v11 = vor.u32 %v3838_v3, %v2990_v0  ;;  %v5306_v26 = vpop.f32.mrf.mxu0  ;;  %v5327_v37 = vld [vmem:[%s5790_s4] sm:$0xff]  ;;  %v1925_v3 = vld [vmem:[%s5790_s4 + $0x58] sm:$0xff]  ;;  %v1927_v12 = vld [vmem:[%s5790_s4 + $0x68] sm:$0xff] }
  0xbf   :  { %v3797_v0 = vld [vmem:[%s5788_s1 + $0xa0] sm:$0xf0] }
  0xc0   :  { %1813 = vmatpush.bf16.msra.mxu0 %v2819_v53  ;;  %v2831_v6 = vor.u32 %v3797_v0, %v2830_v63 }
  0xc1   :  { %1862 = vmatpush.bf16.msrb.mxu1 %v3079_v40  ;;  %3520 = vmatmul.msk.bf16.vlgmr.msrb.gmra.mxu3 %vm1294_vm1, %v4164_v51  ;;  %v2823_v40 = vor.u32 %v3796_v31, %v2822_v30 }
  0xc2   :  { %1834 = vmatpush.bf16.msra.mxu3 %v3243_v27  ;;  %1852 = vmatpush.bf16.msra.mxu2 %v3495_v54  ;;  %v2907_v27 = vor.u32 %v3817_v18, %v2906_v17  ;;  %v5358_v54 = vpop.f32.mrf.mxu1  ;;  %v1917_v18 = vld [vmem:[%s5790_s4 + $0x18] sm:$0xff] }
  0xc3   :  { %1814 = vmatmul.bf16.vlgmr.msra.gmra.mxu0 %v4298_v56 }
  0xc4   :  { %1877 = vmatpush.bf16.msrb.mxu0 %v1359_v1 }
  0xc5   :  { %1863 = vmatpush.bf16.msrb.mxu1 %v2995_v57  ;;  %v1453_v57 = vpop.f32.mrf.mxu3 }
  0xc6   :  { %1835 = vmatpush.bf16.msra.mxu3 %v3159_v44  ;;  %1884 = vmatpush.bf16.msrb.mxu2 %v3419_v58  ;;  %v1362_v44 = vand.u32 %v4090_v13, %v1104_v33  ;;  %v1466_v48 = vpop.f32.mrf.mxu0  ;;  %v2998_v13 = vld [vmem:[%s5788_s1 + $0x1a0] sm:$0xf]  ;;  %v2914_v58 = vld [vmem:[%s5788_s1 + $0xf8] sm:$0xf]  ;;  %v254_v33 = vperm.slane %v5464_v32, 1 }
  0xc7   :  { %v2999_v53 = vor.u32 %v3839_v50, %v2998_v13  ;;  %v2915_v62 = vor.u32 %v3818_v59, %v2914_v58  ;;  %v256_v50 = vperm.slane %v5464_v32, 3 }
  0xc8   :  { %1878 = vmatpush.bf16.msrb.mxu0 %v3499_v16  ;;  %v5388_v4 = vpop.f32.mrf.mxu2  ;;  %v5418_v16 = vld [vmem:[%s5791_s3 + $0x8] sm:$0xff] }
  0xc9   :  { %1864 = vmatpush.bf16.msrb.mxu1 %v2911_v8  ;;  %v1918_v8 = vld [vmem:[%s5790_s4 + $0x20] sm:$0xff] }
  0xca   :  { %1836 = vmatpush.bf16.msra.mxu3 %v3075_v61  ;;  %1885 = vmatpush.bf16.msrb.mxu2 %v3335_v9  ;;  %v1926_v61 = vld [vmem:[%s5790_s4 + $0x60] sm:$0xff]  ;;  %v1518_v7 = vpop.f32.mrf.mxu1 }
  0xcb   :  { %v258_v7 = vperm.slane %v5464_v32, 5 }
  0xcc   :  { %1955 = vmatpush.msra.mxu0 %v5304_v22 }
  0xcd   :  { %1865 = vmatpush.bf16.msrb.mxu1 %v2827_v24  ;;  %3522 = vmatmul.msk.bf16.vlgmr.msra.gmra.mxu2 %vm1294_vm1, %v4164_v51  ;;  %v5398_v9 = vpop.f32.mrf.mxu3 }
  0xce   :  { %1837 = vmatpush.bf16.msra.mxu3 %v2991_v11  ;;  %1886 = vmatpush.bf16.msrb.mxu2 %v3251_v25  ;;  %v5383_v1 = vpop.f32.mrf.mxu0 }
  0xcf   :  { %1956 = vmatpush.msra.mxu0 %v5327_v37 }
  0xd0   :  { %1866 = vmatmul.bf16.vlgmr.msrb.gmra.mxu1 %v4298_v56  ;;  %v1479_v15 = vpop.f32.mrf.mxu2 }
  0xd1   :  { %1984 = vmatpush.msra.mxu1 %v1922_v36  ;;  %v253_v36 = vperm.slane %v5464_v32, 0 }
  0xd2   :  { %1838 = vmatpush.bf16.msra.mxu3 %v2907_v27  ;;  %1887 = vmatpush.bf16.msrb.mxu2 %v3167_v38  ;;  %v5451_v27 = vld [vmem:[%s5791_s3 + $0x18] sm:$0xff] }
  0xd3   :  { %1985 = vmatpush.msra.mxu1 %v1915_v43  ;;  %3523 = vmatmul.msk.bf16.vlgmr.msrb.gmra.mxu0 %vm1294_vm1, %v4164_v51 }
  0xd4   :  { %2071 = vmatpush.msrb.mxu0 %v1925_v3 }
  0xd5   :  { %2100 = vmatpush.msrb.mxu1 %v1926_v61  ;;  %v5420_v17 = vpop.f32.mrf.mxu1  ;;  %v1492_v19 = vpop.f32.mrf.mxu3 }
  0xd6   :  { %1839 = vmatpush.bf16.msra.mxu3 %v2823_v40  ;;  %1888 = vmatpush.bf16.msrb.mxu2 %v3083_v47  ;;  %v1505_v11 = vpop.f32.mrf.mxu0 }
  0xd7   :  { %2072 = vmatpush.msrb.mxu0 %v1918_v8  ;;  %2101 = vmatpush.msrb.mxu1 %v1919_v10 }
  0xd8   :  { %v5442_v24 = vpop.f32.mrf.mxu2 }
  0xd9   :  { %1840 = vmatmul.bf16.vlgmr.msra.gmra.mxu3 %v4298_v56 }
  0xda   :  { %1903 = vmatpush.bf16.msrb.mxu3 %v1362_v44  ;;  %1889 = vmatpush.bf16.msrb.mxu2 %v2999_v53  ;;  %v255_v53 = vperm.slane %v5464_v32, 2 }
  0xde   :  { %1904 = vmatpush.bf16.msrb.mxu3 %v3503_v52  ;;  %1890 = vmatpush.bf16.msrb.mxu2 %v2915_v62 }
  0xe0   :  { %3529 = vmatmul.msk.f32.vlgmr.msra.gmra.mxu1 %vm1928_vm2, %v5393_v5  ;;  %v1544_v30 = vpop.f32.mrf.mxu2 }
  0xe2   :  { %2013 = vmatpush.msra.mxu3 %v1923_v55  ;;  %1891 = vmatpush.bf16.msrb.mxu2 %v2831_v6 }
  0xe3   :  { %3525 = vmatmul.msk.f32.vlgmr.msra.gmra.mxu0 %vm1928_vm2, %v5393_v5 }
  0xe4   :  { %2014 = vmatpush.msra.mxu3 %v1916_v60  ;;  %v5446_v25 = vpop.f32.mrf.mxu3 }
  0xe5   :  { %1892 = vmatmul.bf16.vlgmr.msrb.gmra.mxu2 %v4298_v56  ;;  %v5433_v56 = vpop.f32.mrf.mxu0 }
  0xe6   :  { %4022 = vmatpush.msra.mxu2 %v5304_v22  ;;  %v1557_v22 = vpop.f32.mrf.mxu1 }
  0xe8   :  { %4023 = vmatpush.msra.mxu2 %v5327_v37  ;;  %3530 = vmatmul.msk.f32.gmra.mxu1 %vm1928_vm2, %v5418_v16 }
  0xe9   :  { %3524 = vmatmul.msk.bf16.vlgmr.msrb.gmra.mxu3 %vm1294_vm1, %v4164_v51  ;;  %v1920_v51 = vld [vmem:[%s5790_s4 + $0x30] sm:$0xff] }
  0xea   :  { %2129 = vmatpush.msrb.mxu3 %v1927_v12  ;;  %2042 = vmatpush.msrb.mxu2 %v1924_v14 }
  0xeb   :  { %3526 = vmatmul.msk.f32.gmra.mxu0 %vm1928_vm2, %v5418_v16 }
  0xec   :  { %2043 = vmatpush.msrb.mxu2 %v1917_v18  ;;  %2130 = vmatpush.msrb.mxu3 %v1920_v51  ;;  %v1531_v31 = vpop.f32.mrf.mxu3 }
  0xed   :  { %v1570_v28 = vpop.f32.mrf.mxu0 }
  0xee   :  { %v1620_v29 = vpop.f32.mrf.mxu1  ;;  %v260_v28 = vperm.slane %v5464_v32, 7 }
  0xf0   :  { %3531 = vmatmul.msk.f32.gmra.mxu1 %vm1928_vm2, %v5438_v21  ;;  %v1581_v42 = vpop.f32.mrf.mxu2 }
  0xf1   :  { %v1582_v43 = vadd.f32 %v1581_v42, %v253_v36 }
  0xf3   :  { %3527 = vmatmul.msk.f32.gmra.mxu0 %vm1928_vm2, %v5438_v21 }
  0xf4   :  { %v1594_v41 = vpop.f32.mrf.mxu3 }
  0xf5   :  { %3528 = vmatmul.msk.f32.vlgmr.msra.gmra.mxu2 %vm1928_vm2, %v5451_v27  ;;  %v1607_v37 = vpop.f32.mrf.mxu0  ;;  %v5478_v45 = vadd.f32 %v1594_v41, %v1582_v43 }
  0xf6   :  { %v1622_v38 = vpop.f32.mrf.mxu1  ;;  %v1608_v40 = vadd.f32 %v1607_v37, %v254_v33  ;;  %v259_v33 = vperm.slane %v5464_v32, 6 }
  0xf8   :  { %3532 = vmatmul.msk.f32.gmra.mxu1 %vm1928_vm2, %v5451_v27  ;;  %v5476_v44 = vadd.f32 %v1620_v29, %v1608_v40  ;;  %v1583_v13 = vpop.f32.mrf.mxu2 }
  0xf9   :  { %3533 = vmatmul.msk.f32.vlgmr.msra.gmra.mxu3 %vm1928_vm2, %v5393_v5  ;;  %v3980_v13 = vld [vmem:[%s5793_s5 + $0x70] sm:$0xff] }
  0xfb   :  { %3541 = vmatmul.msk.f32.vlgmr.msrb.gmra.mxu0 %vm1928_vm2, %v5393_v5 }
  0xfc   :  { %v1596_v47 = vpop.f32.mrf.mxu3 }
  0xfd   :  { %3537 = vmatmul.msk.f32.vlgmr.msrb.gmra.mxu2 %vm1928_vm2, %v5393_v5  ;;  %v1609_v46 = vpop.f32.mrf.mxu0 }
  0xfe   :  { %v1659_v48 = vpop.f32.mrf.mxu1 }
  0xff   :  { %v1660_v52 = vadd.f32 %v1659_v48, %v256_v50  ;;  %v3973_v48 = vld [vmem:[%s5793_s5 + $0x38] sm:$0xff] }
 0x100   :  { %3545 = vmatmul.msk.f32.vlgmr.msrb.gmra.mxu1 %vm1928_vm2, %v5393_v5  ;;  %v1646_v61 = vpop.f32.mrf.mxu2  ;;  %2648 = vmatpush.bf16.msra.mxu2 %v3973_v48  ;;  %v4005_v48 = vld [vmem:[%s5793_s5 + $0x138] sm:$0xff] }
 0x101   :  { %3534 = vmatmul.msk.f32.gmra.mxu3 %vm1928_vm2, %v5418_v16 }
 0x103   :  { %3542 = vmatmul.msk.f32.gmra.mxu0 %vm1928_vm2, %v5418_v16 }
 0x105   :  { %3538 = vmatmul.msk.f32.gmra.mxu2 %vm1928_vm2, %v5418_v16  ;;  %v1672_v57 = vpop.f32.mrf.mxu0 }
 0x106   :  { %v1661_v55 = vpop.f32.mrf.mxu1  ;;  %v5498_v59 = vadd.f32 %v1672_v57, %v1660_v52 }
 0x107   :  { %v3972_v55 = vld [vmem:[%s5793_s5 + $0x30] sm:$0xff] }
 0x108   :  { %3546 = vmatmul.msk.f32.gmra.mxu1 %vm1928_vm2, %v5418_v16  ;;  %v1648_v6 = vpop.f32.mrf.mxu2  ;;  %2649 = vmatpush.bf16.msra.mxu2 %v3972_v55 }
 0x109   :  { %3535 = vmatmul.msk.f32.gmra.mxu3 %vm1928_vm2, %v5438_v21 }
 0x10b   :  { %3543 = vmatmul.msk.f32.gmra.mxu0 %vm1928_vm2, %v5438_v21 }
 0x10c   :  { %v1633_v58 = vpop.f32.mrf.mxu3 }
 0x10d   :  { %3539 = vmatmul.msk.f32.gmra.mxu2 %vm1928_vm2, %v5438_v21  ;;  %v1634_v60 = vadd.f32 %v1633_v58, %v255_v53  ;;  %v1674_v63 = vpop.f32.mrf.mxu0 }
 0x10e   :  { %v1724_v0 = vpop.f32.mrf.mxu1 }
 0x10f   :  { %v5504_v62 = vadd.f32 %v1646_v61, %v1634_v60  ;;  %v3979_v61 = vld [vmem:[%s5793_s5 + $0x68] sm:$0xff] }
 0x110   :  { %3547 = vmatmul.msk.f32.gmra.mxu1 %vm1928_vm2, %v5438_v21 }
 0x111   :  { %3536 = vmatmul.msk.f32.gmra.mxu3 %vm1928_vm2, %v5451_v27 }
 0x113   :  { %3544 = vmatmul.msk.f32.gmra.mxu0 %vm1928_vm2, %v5451_v27 }
 0x114   :  { %v1635_v3 = vpop.f32.mrf.mxu3 }
 0x115   :  { %3540 = vmatmul.msk.f32.gmra.mxu2 %vm1928_vm2, %v5451_v27  ;;  %v3971_v3 = vld [vmem:[%s5793_s5 + $0x28] sm:$0xff] }
 0x116   :  { %v1726_v10 = vpop.f32.mrf.mxu1  ;;  %2650 = vmatpush.bf16.msra.mxu2 %v3971_v3  ;;  %v3986_v3 = vld [vmem:[%s5793_s5 + $0xa0] sm:$0xff] }
 0x117   :  { %v3970_v10 = vld [vmem:[%s5793_s5 + $0x20] sm:$0xff] }
 0x118   :  { %3548 = vmatmul.msk.f32.gmra.mxu1 %vm1928_vm2, %v5451_v27  ;;  %v1711_v8 = vpop.f32.mrf.mxu0  ;;  %v1685_v14 = vpop.f32.mrf.mxu2 }
 0x119   :  { %3549 = vmatmul.msk.f32.vlgmr.msrb.gmra.mxu3 %vm1928_vm2, %v5393_v5  ;;  %v257_v5 = vperm.slane %v5464_v32, 4  ;;  %v1712_v11 = vadd.f32 %v1711_v8, %v258_v7  ;;  %v5534_v32 = vld [vmem:[%s5792_s2 + $0x10] sm:$0x1f]  ;;  %v3978_v8 = vld [vmem:[%s5793_s5 + $0x60] sm:$0xff] }
 0x11a   :  { %v262_v50 = vperm.slane %v5534_v32, 1  ;;  %v261_v52 = vperm.slane %v5534_v32, 0  ;;  %2651 = vmatpush.bf16.msra.mxu2 %v3970_v10 }
 0x11b   :  { %v5514_v15 = vadd.f32 %v1724_v0, %v1712_v11  ;;  %v1686_v18 = vadd.f32 %v1685_v14, %v257_v5  ;;  %v264_v11 = vperm.slane %v5534_v32, 3 }
 0x11c   :  { %v1698_v12 = vpop.f32.mrf.mxu3 }
 0x11d   :  { %v5518_v19 = vadd.f32 %v1698_v12, %v1686_v18  ;;  %v3977_v18 = vld [vmem:[%s5793_s5 + $0x58] sm:$0xff] }
 0x120   :  { %v1713_v51 = vpop.f32.mrf.mxu0  ;;  %v1687_v29 = vpop.f32.mrf.mxu2 }
 0x121   :  { %3550 = vmatmul.msk.f32.gmra.mxu3 %vm1928_vm2, %v5418_v16  ;;  %v3968_v29 = vld [vmem:[%s5793_s5 + $0x10] sm:$0xff] }
 0x124   :  { %v1700_v16 = vpop.f32.mrf.mxu3 }
 0x125   :  { %v1763_v22 = vpop.f32.mrf.mxu1  ;;  %v3976_v16 = vld [vmem:[%s5793_s5 + $0x50] sm:$0xff] }
 0x126   :  { %v1764_v30 = vadd.f32 %v1763_v22, %v260_v28  ;;  %v3969_v22 = vld [vmem:[%s5793_s5 + $0x18] sm:$0xff] }
 0x127   :  { %2652 = vmatpush.bf16.msra.mxu2 %v3969_v22  ;;  %v3985_v22 = vld [vmem:[%s5793_s5 + $0x98] sm:$0xff] }
 0x128   :  { %v1776_v36 = vpop.f32.mrf.mxu0  ;;  %v1750_v38 = vpop.f32.mrf.mxu2 }
 0x129   :  { %3551 = vmatmul.msk.f32.gmra.mxu3 %vm1928_vm2, %v5438_v21  ;;  %v5524_v37 = vadd.f32 %v1776_v36, %v1764_v30 }
 0x12b   :  { %2653 = vmatpush.bf16.msra.mxu2 %v3968_v29 }
 0x12d   :  { %v1765_v31 = vpop.f32.mrf.mxu1 }
 0x130   :  { %v1778_v42 = vpop.f32.mrf.mxu0  ;;  %v1752_v47 = vpop.f32.mrf.mxu2 }
 0x131   :  { %3552 = vmatmul.msk.f32.gmra.mxu3 %vm1928_vm2, %v5451_v27  ;;  %v3981_v27 = vld [vmem:[%s5793_s5 + $0x78] sm:$0xff] }
 0x132   :  { %2661 = vmatpush.bf16.msra.mxu0 %v3981_v27  ;;  %v3989_v42 = vld [vmem:[%s5793_s5 + $0xb8] sm:$0xff]  ;;  %v3988_v27 = vld [vmem:[%s5793_s5 + $0xb0] sm:$0xff] }
 0x133   :  { %2674 = vmatpush.bf16.msra.mxu1 %v3989_v42  ;;  %v3984_v42 = vld [vmem:[%s5793_s5 + $0x90] sm:$0xff] }
 0x134   :  { %v1737_v21 = vpop.f32.mrf.mxu3 }
 0x135   :  { %v1738_v40 = vadd.f32 %v1737_v21, %v259_v33  ;;  %v1828_v43 = vpop.f32.mrf.mxu1  ;;  %v3975_v21 = vld [vmem:[%s5793_s5 + $0x48] sm:$0xff] }
 0x136   :  { %2662 = vmatpush.bf16.msra.mxu0 %v3980_v13 }
 0x137   :  { %v5526_v41 = vadd.f32 %v1750_v38, %v1738_v40  ;;  %v3967_v38 = vld [vmem:[%s5793_s5 + $0x8] sm:$0xff]  ;;  %2675 = vmatpush.bf16.msra.mxu1 %v3988_v27  ;;  %v4009_v27 = vld [vmem:[%s5793_s5 + $0x158] sm:$0xff] }
 0x138   :  { %2654 = vmatpush.bf16.msra.mxu2 %v3967_v38 }
 0x13a   :  { %2663 = vmatpush.bf16.msra.mxu0 %v3979_v61  ;;  %v3996_v61 = vld [vmem:[%s5793_s5 + $0xf0] sm:$0xff] }
 0x13c   :  { %v1739_v46 = vpop.f32.mrf.mxu3 }
 0x13d   :  { %v1830_v53 = vpop.f32.mrf.mxu1  ;;  %v3966_v46 = vld [vmem:[%s5793_s5] sm:$0xff] }
 0x13e   :  { %2664 = vmatpush.bf16.msra.mxu0 %v3978_v8  ;;  %2655 = vmatpush.bf16.msra.mxu2 %v3966_v46  ;;  %v3997_v53 = vld [vmem:[%s5793_s5 + $0xf8] sm:$0xff]  ;;  %v4003_v8 = vld [vmem:[%s5793_s5 + $0x128] sm:$0xff] }
 0x13f   :  { %2687 = vmatpush.bf16.msra.mxu3 %v3997_v53 }
 0x140   :  { %v1815_v57 = vpop.f32.mrf.mxu0  ;;  %v1789_v60 = vpop.f32.mrf.mxu2 }
 0x141   :  { %v1816_v58 = vadd.f32 %v1815_v57, %v262_v50  ;;  %v1790_v63 = vadd.f32 %v1789_v60, %v261_v52  ;;  %v4013_v52 = vld [vmem:[%s5793_s5 + $0x178] sm:$0xff]  ;;  %v3987_v57 = vld [vmem:[%s5793_s5 + $0xa8] sm:$0xff]  ;;  %v4012_v60 = vld [vmem:[%s5793_s5 + $0x170] sm:$0xff] }
 0x142   :  { %2665 = vmatpush.bf16.msra.mxu0 %v3977_v18  ;;  %2700 = vmatpush.bf16.msrb.mxu2 %v4005_v48 }
 0x143   :  { %v5553_v6 = vadd.f32 %v1828_v43, %v1816_v58  ;;  %v3974_v43 = vld [vmem:[%s5793_s5 + $0x40] sm:$0xff]  ;;  %v4004_v58 = vld [vmem:[%s5793_s5 + $0x130] sm:$0xff]  ;;  %2676 = vmatpush.bf16.msra.mxu1 %v3987_v57  ;;  %2688 = vmatpush.bf16.msra.mxu3 %v3996_v61  ;;  %v3983_v57 = vld [vmem:[%s5793_s5 + $0x88] sm:$0xff] }
 0x144   :  { %v1802_v0 = vpop.f32.mrf.mxu3 }
 0x145   :  { %v5555_v7 = vadd.f32 %v1802_v0, %v1790_v63  ;;  %v265_v0 = vperm.slane %v5534_v32, 4 }
 0x146   :  { %2666 = vmatpush.bf16.msra.mxu0 %v3976_v16  ;;  %2701 = vmatpush.bf16.msrb.mxu2 %v4004_v58  ;;  %v4002_v16 = vld [vmem:[%s5793_s5 + $0x120] sm:$0xff]  ;;  %v4000_v58 = vld [vmem:[%s5793_s5 + $0x110] sm:$0xff] }
 0x147   :  { %2677 = vmatpush.bf16.msra.mxu1 %v3986_v3 }
 0x148   :  { %v1817_v5 = vpop.f32.mrf.mxu0  ;;  %v1791_v14 = vpop.f32.mrf.mxu2 }
 0x149   :  { %v4011_v5 = vld [vmem:[%s5793_s5 + $0x168] sm:$0xff] }
 0x14a   :  { %2667 = vmatpush.bf16.msra.mxu0 %v3975_v21  ;;  %2702 = vmatpush.bf16.msrb.mxu2 %v4003_v8  ;;  %v3995_v14 = vld [vmem:[%s5793_s5 + $0xe8] sm:$0xff] }
 0x14b   :  { %2689 = vmatpush.bf16.msra.mxu3 %v3995_v14  ;;  %2678 = vmatpush.bf16.msra.mxu1 %v3985_v22  ;;  %v4007_v14 = vld [vmem:[%s5793_s5 + $0x148] sm:$0xff] }
 0x14c   :  { %v1804_v51 = vpop.f32.mrf.mxu3  ;;  %v3991_v22 = vld [vmem:[%s5793_s5 + $0xc8] sm:$0xff] }
 0x14d   :  { %v1867_v12 = vpop.f32.mrf.mxu1 }
 0x14e   :  { %v1868_v28 = vadd.f32 %v1867_v12, %v264_v11  ;;  %2668 = vmatpush.bf16.msra.mxu0 %v3974_v43  ;;  %v5636_v11 = vld [vmem:[%s5792_s2] sm:$0xff]  ;;  %2703 = vmatpush.bf16.msrb.mxu2 %v4002_v16  ;;  %v4001_v43 = vld [vmem:[%s5793_s5 + $0x118] sm:$0xff] }
 0x14f   :  { %v246_v29 = vperm.slane %v5636_v11, 1  ;;  %v245_v21 = vperm.slane %v5636_v11, 0  ;;  %v252_v46 = vperm.slane %v5636_v11, 7  ;;  %2679 = vmatpush.bf16.msra.mxu1 %v3984_v42  ;;  %v3990_v42 = vld [vmem:[%s5793_s5 + $0xc0] sm:$0xff] }
 0x150   :  { %v1880_v30 = vpop.f32.mrf.mxu0  ;;  %v5578_v36 = vpop.f32.mrf.mxu2 }
 0x151   :  { %v5576_v31 = vadd.f32 %v1880_v30, %v1868_v28  ;;  %v4010_v28 = vld [vmem:[%s5793_s5 + $0x160] sm:$0xff]  ;;  %v1400_v48 = vadd.f32 %v5241_v49, %v246_v29  ;;  %v1374_v53 = vadd.f32 %v5191_v23, %v245_v21  ;;  %v1556_v49 = vadd.f32 %v5420_v17, %v252_v46  ;;  %v3992_v23 = vld [vmem:[%s5793_s5 + $0xd0] sm:$0xff] }
 0x152   :  { %2713 = vmatpush.bf16.msrb.mxu0 %v4013_v52  ;;  %2704 = vmatpush.bf16.msrb.mxu2 %v4001_v43  ;;  %v3993_v52 = vld [vmem:[%s5793_s5 + $0xd8] sm:$0xff]  ;;  %v3982_v17 = vld [vmem:[%s5793_s5 + $0x80] sm:$0xff] }
 0x153   :  { %v1413_v61 = vadd.f32 %v5092_v34, %v1400_v48  ;;  %2680 = vmatpush.bf16.msra.mxu1 %v3983_v57  ;;  %v1387_v3 = vadd.f32 %v5065_v20, %v1374_v53  ;;  %v3999_v34 = vld [vmem:[%s5793_s5 + $0x108] sm:$0xff] }
 0x154   :  { %v4019_v53 = vld [vmem:[%s5793_s5 + $0x1a8] sm:$0xff] }
 0x155   :  { %v1869_v33 = vpop.f32.mrf.mxu1 }
 0x156   :  { %2714 = vmatpush.bf16.msrb.mxu0 %v4012_v60  ;;  %v3994_v33 = vld [vmem:[%s5793_s5 + $0xe0] sm:$0xff]  ;;  %v4008_v60 = vld [vmem:[%s5793_s5 + $0x150] sm:$0xff]  ;;  %2705 = vmatpush.bf16.msrb.mxu2 %v4000_v58  ;;  %v247_v58 = vperm.slane %v5636_v11, 2 }
 0x157   :  { %2690 = vmatpush.bf16.msra.mxu3 %v3994_v33  ;;  %2681 = vmatpush.bf16.msra.mxu1 %v3982_v17  ;;  %v4016_v17 = vld [vmem:[%s5793_s5 + $0x190] sm:$0xff] }
 0x158   :  { %v1882_v47 = vpop.f32.mrf.mxu0  ;;  %v1856_v50 = vpop.f32.mrf.mxu2 }
 0x15a   :  { %2715 = vmatpush.bf16.msrb.mxu0 %v4011_v5  ;;  %v1569_v5 = vadd.f32 %v5433_v56, %v1556_v49  ;;  %2706 = vmatpush.bf16.msrb.mxu2 %v3999_v34  ;;  %v248_v34 = vperm.slane %v5636_v11, 3 }
 0x15b   :  { %2691 = vmatpush.bf16.msra.mxu3 %v3993_v52 }
 0x15c   :  { %v5586_v40 = vpop.f32.mrf.mxu3 }
 0x15d   :  { %v5603_v13 = vpop.f32.mrf.mxu1 }
 0x15e   :  { %2716 = vmatpush.bf16.msrb.mxu0 %v4010_v28 }
 0x15f   :  { %2692 = vmatpush.bf16.msra.mxu3 %v3992_v23  ;;  %v4017_v23 = vld [vmem:[%s5793_s5 + $0x198] sm:$0xff] }
 0x160   :  { %v1958_v63 = vpop.f32.mrf.mxu0 }
 0x162   :  { %2717 = vmatpush.bf16.msrb.mxu0 %v4009_v27 }
 0x163   :  { %2693 = vmatpush.bf16.msra.mxu3 %v3991_v22  ;;  %v1452_v22 = vadd.f32 %v5329_v39, %v248_v34 }
 0x164   :  { %v1843_v55 = vpop.f32.mrf.mxu3 }
 0x165   :  { %v1990_v10 = vpop.f32.mrf.mxu1  ;;  %v1465_v39 = vadd.f32 %v5306_v26, %v1452_v22 }
 0x166   :  { %2718 = vmatpush.bf16.msrb.mxu0 %v4008_v60  ;;  %v2159_v20 = vmul.f32 %v1990_v10, %v5478_v45  ;;  %v4021_v45 = vld [vmem:[%s5793_s5 + $0x1b8] sm:$0xff]  ;;  %v4006_v10 = vld [vmem:[%s5793_s5 + $0x140] sm:$0xff] }
 0x167   :  { %2726 = vmatpush.bf16.msrb.mxu1 %v4021_v45  ;;  %2694 = vmatpush.bf16.msra.mxu3 %v3990_v42 }
 0x168   :  { %v1893_v12 = vpop.f32.mrf.mxu2  ;;  %v1961_v38 = vpop.f32.mrf.mxu0 }
 0x169   :  { %v1894_v18 = vadd.f32 %v1893_v12, %v265_v0  ;;  %v2145_v0 = vmul.f32 %v5603_v13, %v1413_v61  ;;  %v2144_v13 = vmul.f32 %v1958_v63, %v1387_v3  ;;  %v2158_v16 = vmul.f32 %v1961_v38, %v1569_v5  ;;  %v3998_v63 = vld [vmem:[%s5793_s5 + $0x100] sm:$0xff] }
 0x16a   :  { %2719 = vmatpush.bf16.msrb.mxu0 %v4007_v14  ;;  %2707 = vmatpush.bf16.msrb.mxu2 %v3998_v63  ;;  %v249_v3 = vperm.slane %v5636_v11, 4  ;;  %v263_v14 = vperm.slane %v5534_v32, 2 }
 0x16c   :  { %v1906_v51 = vpop.f32.mrf.mxu3 }
 0x16d   :  { %v5651_v30 = vadd.f32 %v1906_v51, %v1894_v18  ;;  %v1993_v47 = vpop.f32.mrf.mxu1 }
 0x16e   :  { %v2173_v56 = vmul.f32 %v1993_v47, %v5524_v37  ;;  %2720 = vmatpush.bf16.msrb.mxu0 %v4006_v10 }
 0x170   :  { %v1895_v50 = vpop.f32.mrf.mxu2  ;;  %v1964_v8 = vpop.f32.mrf.mxu0 }
 0x171   :  { %v2172_v21 = vmul.f32 %v1964_v8, %v5526_v41  ;;  %v4020_v41 = vld [vmem:[%s5793_s5 + $0x1b0] sm:$0xff]  ;;  %v250_v8 = vperm.slane %v5636_v11, 5 }
 0x172   :  { %2727 = vmatpush.bf16.msrb.mxu1 %v4020_v41 }
 0x174   :  { %v1908_v55 = vpop.f32.mrf.mxu3 }
 0x175   :  { %v1996_v12 = vpop.f32.mrf.mxu1  ;;  %v4018_v55 = vld [vmem:[%s5793_s5 + $0x1a0] sm:$0xff] }
 0x176   :  { %v2152_v18 = vadd.f32 %v2145_v0, %v1996_v12  ;;  %2728 = vmatpush.bf16.msrb.mxu1 %v4019_v53  ;;  %v1426_v0 = vadd.f32 %v5268_v2, %v247_v58  ;;  %v1478_v12 = vadd.f32 %v5388_v4, %v249_v3  ;;  %v1504_v2 = vadd.f32 %v5383_v1, %v250_v8 }
 0x177   :  { %v251_v58 = vperm.slane %v5636_v11, 6 }
 0x178   :  { %v1967_v51 = vpop.f32.mrf.mxu2  ;;  %v2166_v28 = vadd.f32 %v2159_v20, %v2152_v18  ;;  %v2074_v47 = vpop.f32.mrf.mxu0  ;;  %v1491_v4 = vadd.f32 %v5398_v9, %v1478_v12 }
 0x179   :  { %v2151_v29 = vadd.f32 %v2144_v13, %v1967_v51  ;;  %v1439_v13 = vadd.f32 %v5212_v35, %v1426_v0 }
 0x17a   :  { %v2180_v38 = vadd.f32 %v2173_v56, %v2166_v28  ;;  %2729 = vmatpush.bf16.msrb.mxu1 %v4018_v55  ;;  %v4015_v56 = vld [vmem:[%s5793_s5 + $0x188] sm:$0xff]  ;;  %v1842_v28 = vadd.f32 %v5586_v40, %v263_v14  ;;  %v2148_v1 = vmul.f32 %v2074_v47, %v1491_v4  ;;  %v4014_v40 = vld [vmem:[%s5793_s5 + $0x180] sm:$0xff] }
 0x17b   :  { %v2165_v37 = vadd.f32 %v2158_v16, %v2151_v29  ;;  %v1517_v29 = vadd.f32 %v5358_v54, %v1504_v2 }
 0x17c   :  { %v2016_v33 = vpop.f32.mrf.mxu3  ;;  %2187 = vst [vmem:[%s5794_s6 + $0x8] sm:$0xff] %v2180_v38  ;;  %v2194_v43 = vpack.c.bf16 %v2180_v38, %v2180_v38 }
 0x17d   :  { %v2179_v46 = vadd.f32 %v2172_v21, %v2165_v37  ;;  %v2103_v27 = vpop.f32.mrf.mxu1  ;;  %v2146_v18 = vmul.f32 %v2016_v33, %v1439_v13 }
 0x17e   :  { %2669 = vmatmul.bf16.vlgmr.msra.gmra.mxu0 %v2194_v43  ;;  %2730 = vmatpush.bf16.msrb.mxu1 %v4017_v23  ;;  %v2149_v45 = vmul.f32 %v2103_v27, %v1517_v29 }
 0x17f   :  { %2186 = vst [vmem:[%s5794_s6] sm:$0xff] %v2179_v46  ;;  %v2193_v48 = vpack.c.bf16 %v2179_v46, %v2179_v46 }
 0x180   :  { %v2045_v50 = vpop.f32.mrf.mxu2  ;;  %v2077_v57 = vpop.f32.mrf.mxu0 }
 0x181   :  { %2656 = vmatmul.bf16.vlgmr.msra.gmra.mxu2 %v2193_v48  ;;  %v2162_v9 = vmul.f32 %v2077_v57, %v5498_v59  ;;  %v2147_v37 = vmul.f32 %v2045_v50, %v1465_v39 }
 0x182   :  { %2731 = vmatpush.bf16.msrb.mxu1 %v4016_v17 }
 0x184   :  { %v2019_v52 = vpop.f32.mrf.mxu3 }
 0x185   :  { %v2106_v49 = vpop.f32.mrf.mxu1  ;;  %v2160_v32 = vmul.f32 %v2019_v52, %v5476_v44  ;;  %v1855_v44 = vadd.f32 %v5578_v36, %v1842_v28 }
 0x186   :  { %2732 = vmatpush.bf16.msrb.mxu1 %v4015_v56  ;;  %v2163_v42 = vmul.f32 %v2106_v49, %v5518_v19 }
 0x188   :  { %v2048_v60 = vpop.f32.mrf.mxu2  ;;  %v2080_v5 = vpop.f32.mrf.mxu0 }
 0x189   :  { %v2176_v43 = vmul.f32 %v2080_v5, %v1855_v44  ;;  %v2161_v59 = vmul.f32 %v2048_v60, %v5504_v62  ;;  %v1530_v60 = vadd.f32 %v5446_v25, %v251_v58 }
 0x18a   :  { %2733 = vmatpush.bf16.msrb.mxu1 %v4014_v40 }
 0x18c   :  { %v2022_v61 = vpop.f32.mrf.mxu3 }
 0x18d   :  { %v2109_v20 = vpop.f32.mrf.mxu1  ;;  %v2174_v33 = vmul.f32 %v2022_v61, %v5555_v7  ;;  %v1543_v61 = vadd.f32 %v5442_v24, %v1530_v60 }
 0x18e   :  { %v2177_v36 = vmul.f32 %v2109_v20, %v5576_v31 }
 0x190   :  { %v2051_v51 = vpop.f32.mrf.mxu2  ;;  %v2083_v10 = vpop.f32.mrf.mxu0 }
 0x191   :  { %v2155_v38 = vadd.f32 %v2148_v1, %v2083_v10  ;;  %v2175_v19 = vmul.f32 %v2051_v51, %v5553_v6 }
 0x193   :  { %v2169_v46 = vadd.f32 %v2162_v9, %v2155_v38 }
 0x194   :  { %v2025_v16 = vpop.f32.mrf.mxu3 }
 0x195   :  { %v2153_v35 = vadd.f32 %v2146_v18, %v2025_v16  ;;  %v2112_v54 = vpop.f32.mrf.mxu1  ;;  %v2183_v50 = vadd.f32 %v2176_v43, %v2169_v46 }
 0x196   :  { %v2156_v7 = vadd.f32 %v2149_v45, %v2112_v54 }
 0x197   :  { %v2167_v63 = vadd.f32 %v2160_v32, %v2153_v35  ;;  %2190 = vst [vmem:[%s5794_s6 + $0x20] sm:$0xff] %v2183_v50  ;;  %v2197_v55 = vpack.c.bf16 %v2183_v50, %v2183_v50 }
 0x198   :  { %v2054_v47 = vpop.f32.mrf.mxu2  ;;  %v2170_v41 = vadd.f32 %v2163_v42, %v2156_v7 }
 0x199   :  { %v2181_v21 = vadd.f32 %v2174_v33, %v2167_v63  ;;  %v2154_v27 = vadd.f32 %v2147_v37, %v2054_v47  ;;  %2708 = vmatmul.bf16.vlgmr.msrb.gmra.mxu2 %v2197_v55 }
 0x19a   :  { %v2184_v52 = vadd.f32 %v2177_v36, %v2170_v41 }
 0x19b   :  { %2188 = vst [vmem:[%s5794_s6 + $0x10] sm:$0xff] %v2181_v21  ;;  %v2195_v26 = vpack.c.bf16 %v2181_v21, %v2181_v21  ;;  %v2168_v53 = vadd.f32 %v2161_v59, %v2154_v27 }
 0x19c   :  { %v2132_v48 = vpop.f32.mrf.mxu3  ;;  %2191 = vst [vmem:[%s5794_s6 + $0x28] sm:$0xff] %v2184_v52  ;;  %v2198_v62 = vpack.c.bf16 %v2184_v52, %v2184_v52 }
 0x19d   :  { %2682 = vmatmul.bf16.vlgmr.msra.gmra.mxu1 %v2195_v26  ;;  %v2182_v31 = vadd.f32 %v2175_v19, %v2168_v53  ;;  %v2150_v23 = vmul.f32 %v2132_v48, %v1543_v61 }
 0x19e   :  { %2721 = vmatmul.bf16.vlgmr.msrb.gmra.mxu0 %v2198_v62 }
 0x19f   :  { %2189 = vst [vmem:[%s5794_s6 + $0x18] sm:$0xff] %v2182_v31  ;;  %v2196_v57 = vpack.c.bf16 %v2182_v31, %v2182_v31 }
 0x1a1   :  { %2695 = vmatmul.bf16.vlgmr.msra.gmra.mxu3 %v2196_v57 }
 0x1a4   :  { %v2135_v6 = vpop.f32.mrf.mxu3 }
 0x1a5   :  { %v2164_v3 = vmul.f32 %v2135_v6, %v5514_v15 }
 0x1ac   :  { %v2138_v49 = vpop.f32.mrf.mxu3 }
 0x1ad   :  { %v2178_v17 = vmul.f32 %v2138_v49, %v5651_v30 }
 0x1b4   :  { %v2141_v0 = vpop.f32.mrf.mxu3 }
 0x1b5   :  { %v2157_v8 = vadd.f32 %v2150_v23, %v2141_v0 }
 0x1b7   :  { %v2171_v34 = vadd.f32 %v2164_v3, %v2157_v8 }
 0x1b9   :  { %v2185_v5 = vadd.f32 %v2178_v17, %v2171_v34 }
 0x1bb   :  { %2192 = vst [vmem:[%s5794_s6 + $0x30] sm:$0xff] %v2185_v5  ;;  %v2199_v12 = vpack.c.bf16 %v2185_v5, %v2185_v5 }
 0x1bd   :  { %2734 = vmatmul.bf16.vlgmr.msrb.gmra.mxu1 %v2199_v12 }
 0x1fb   :  { %v2670_v11 = vpop.f32.mrf.mxu0 }
 0x203   :  { %v2672_v25 = vpop.f32.mrf.mxu0 }
 0x204   :  { %v2657_v14 = vpop.f32.mrf.mxu2 }
 0x205   :  { %v2671_v30 = vadd.f32 %v2670_v11, %v2657_v14 }
 0x20c   :  { %v2659_v13 = vpop.f32.mrf.mxu2 }
 0x21a   :  { %v2683_v24 = vpop.f32.mrf.mxu1 }
 0x21b   :  { %v2722_v20 = vpop.f32.mrf.mxu0  ;;  %v2684_v16 = vadd.f32 %v2683_v24, %v2671_v30 }
 0x21c   :  { %v2709_v18 = vpop.f32.mrf.mxu2 }
 0x222   :  { %v2685_v2 = vpop.f32.mrf.mxu1 }
 0x223   :  { %v2724_v51 = vpop.f32.mrf.mxu0 }
 0x224   :  { %v2696_v15 = vpop.f32.mrf.mxu3  ;;  %v2711_v22 = vpop.f32.mrf.mxu2 }
 0x225   :  { %v2697_v28 = vadd.f32 %v2696_v15, %v2684_v16 }
 0x227   :  { %v2710_v4 = vadd.f32 %v2709_v18, %v2697_v28 }
 0x229   :  { %v2723_v32 = vadd.f32 %v2722_v20, %v2710_v4 }
 0x22c   :  { %v2698_v56 = vpop.f32.mrf.mxu3 }
 0x23a   :  { %v2735_v35 = vpop.f32.mrf.mxu1 }
 0x23b   :  { %v2736_v29 = vadd.f32 %v2735_v35, %v2723_v32 }
 0x23d   :  { %2739 = vst [vmem:[%s5795_s7] sm:$0xff] %v2736_v29 }
 0x242   :  { %v2737_v1 = vpop.f32.mrf.mxu1 }

</bundles_post_ra>
